<compile_context>
chip_gen: v7x
topology: tpu7x:2x2x1
jax: 0.10.0
libtpu: 0.0.40
codegen_flags: <defaults>
</compile_context>

<pallas_src>
import jax
import jax.numpy as jnp
from jax import lax
from jax.experimental import pallas as pl
from jax.experimental.pallas import tpu as pltpu

EPS = 1e-5

_VMEM = pl.BlockSpec(memory_space=pltpu.MemorySpace.VMEM)
_SMEM = pl.BlockSpec(memory_space=pltpu.MemorySpace.SMEM)


# ----------------------------------------------------------------------------
# Fused per-repeat Pallas kernel
# ----------------------------------------------------------------------------
def _make_repeat_kernel(N, T, C, H, dilations, n_skips, emit_post_skip):
    """One repeat: [skip 1x1 projections + residual adds] then
    blocks_per_repeat x [1x1 conv -> PReLU -> BN -> depthwise dilated conv
    -> PReLU -> BN -> 1x1 conv -> residual].  Everything in NTC layout,
    activations kept resident (vregs/VMEM) across blocks."""
    B = len(dilations)
    NT = N * T
    inv_nt = 1.0 / float(NT)

    def kernel(*refs):
        i = 0
        inp_ref = refs[i]; i += 1
        prev_refs = refs[i:i + n_skips]; i += n_skips
        skip_refs = []
        for _ in range(n_skips):
            skip_refs.append((refs[i], refs[i + 1])); i += 2
        block_refs = []
        for _ in range(B):
            block_refs.append(refs[i:i + 10]); i += 10
        alpha_ref = refs[i]; i += 1                 # SMEM (2*B,) PReLU alphas
        if emit_post_skip:
            post_ref = refs[i]; i += 1
        out_ref = refs[i]

        # ---- skip ScaleLinear projections + residual adds (fused) ----
        x = inp_ref[...].reshape(NT, C)
        for s in range(n_skips):
            p = prev_refs[s][...].reshape(NT, C)
            w_ref, b_ref = skip_refs[s]
            x = x + jnp.dot(p, w_ref[...],
                            preferred_element_type=jnp.float32) + b_ref[...]
        if emit_post_skip:
            post_ref[...] = x.reshape(N, T, C)      # outputs[index] (aliasing)

        # time index within each utterance (for depthwise edge masks)
        tpos = lax.broadcasted_iota(jnp.int32, (NT, 1), 0) % T

        for n in range(B):
            (w1_ref, b1_ref, wd_ref, bd_ref, w2_ref, b2_ref,
             g1_ref, be1_ref, g2_ref, be2_ref) = block_refs[n]
            d = int(dilations[n])
            a1 = alpha_ref[2 * n]
            a2 = alpha_ref[2 * n + 1]

            # ---- conv1: 1x1 conv C -> H (scale folded into w1/b1) ----
            y = jnp.dot(x, w1_ref[...],
                        preferred_element_type=jnp.float32) + b1_ref[...]

            # ---- norm1: PReLU + BN (one-pass batch stats over N, T) ----
            y = jnp.where(y >= 0, y, a1 * y)
            m1 = jnp.sum(y, axis=0, keepdims=True) * inv_nt
            q1 = jnp.sum(y * y, axis=0, keepdims=True) * inv_nt
            v1 = jnp.maximum(q1 - m1 * m1, 0.0)
            y = (y - m1) * (lax.rsqrt(v1 + EPS) * g1_ref[...]) + be1_ref[...]

            # ---- depthwise dilated conv (k=3, 'same', pad=d), in registers.
            # Taps y[t-d], y[t], y[t+d]; shifted copies built by sublane
            # slice+concat on the flat (N*T, H) activation; per-utterance
            # edges zeroed with an iota mask (also kills cross-batch leak).
            wd = wd_ref[...]                              # (3, H)
            halo = jnp.zeros((d, H), jnp.float32)
            y_m = jnp.concatenate([halo, y[:NT - d, :]], axis=0)   # y[t-d]
            y_m = jnp.where(tpos >= d, y_m, 0.0)
            y_p = jnp.concatenate([y[d:, :], halo], axis=0)        # y[t+d]
            y_p = jnp.where(tpos < T - d, y_p, 0.0)
            u = (wd[0:1, :] * y_m + wd[1:2, :] * y + wd[2:3, :] * y_p
                 + bd_ref[...])

            # ---- norm2: PReLU + BN ----
            u = jnp.where(u >= 0, u, a2 * u)
            m2 = jnp.sum(u, axis=0, keepdims=True) * inv_nt
            q2 = jnp.sum(u * u, axis=0, keepdims=True) * inv_nt
            v2 = jnp.maximum(q2 - m2 * m2, 0.0)
            u = (u - m2) * (lax.rsqrt(v2 + EPS) * g2_ref[...]) + be2_ref[...]

            # ---- conv2: 1x1 conv H -> C (scale folded) + residual ----
            x = x + jnp.dot(u, w2_ref[...],
                            preferred_element_type=jnp.float32) + b2_ref[...]

        out_ref[...] = x.reshape(N, T, C)

    return kernel


# ----------------------------------------------------------------------------
# Pallas wrapper: one fused call per repeat
# ----------------------------------------------------------------------------
def conv1d_repeat_layer(inp, prev_outputs, skip_params, block_params,
                        emit_post_skip):
    N, T, C = inp.shape
    H = block_params[0]["w1"].shape[1]
    B = len(block_params)
    S = len(prev_outputs)
    dilations = tuple(int(bp["dilation"]) for bp in block_params)
    assert all(d < T for d in dilations)

    args = [inp]
    args += list(prev_outputs)
    for sp in skip_params:
        s = sp["s"][0]
        args += [sp["w"] * s, sp["b"] * s]                 # fold skip scale
    alphas = []
    for bp in block_params:
        sc = bp["sc"]
        args += [bp["w1"] * sc[0], bp["b1"] * sc[0],       # fold conv1 scale
                 bp["wd"], bp["bd"],
                 bp["w2"] * sc[1], bp["b2"] * sc[1],       # fold conv2 scale
                 bp["g1"], bp["be1"], bp["g2"], bp["be2"]]
        alphas += [sc[2], sc[3]]
    args.append(jnp.stack(alphas))                         # (2*B,) -> SMEM

    in_specs = [_VMEM] * (1 + 3 * S + 10 * B) + [_SMEM]
    act = jax.ShapeDtypeStruct((N, T, C), jnp.float32)
    if emit_post_skip:
        out_shape = (act, act)
        out_specs = (_VMEM, _VMEM)
    else:
        out_shape = act
        out_specs = _VMEM

    kernel = _make_repeat_kernel(N, T, C, H, dilations, S, emit_post_skip)
    return pl.pallas_call(
        kernel,
        out_shape=out_shape,
        in_specs=in_specs,
        out_specs=out_specs,
        compiler_params=pltpu.CompilerParams(
            vmem_limit_bytes=48 * 1024 * 1024),
    )(*args)


# ----------------------------------------------------------------------------
# Conv1dRepeat forward (mirrors the PyTorch control flow, incl. the in-place
# `inp +=` aliasing of outputs[index])
# ----------------------------------------------------------------------------
def conv1d_repeat_forward(x_nct, params, num_repeats, blocks_per_repeat):
    del blocks_per_repeat  # implied by params["blocks"][index]
    inp = jnp.transpose(x_nct, (0, 2, 1))          # NCT -> NTC
    outputs = [inp]
    skip_index = 0
    for index in range(num_repeats):
        prev = outputs[:index]
        skips = params["skips"][skip_index:skip_index + index]
        # outputs[index] (the post-skip-add activation) is only needed again
        # if a later repeat reads it as a skip source.
        emit_post = 1 <= index <= num_repeats - 2
        res = conv1d_repeat_layer(inp, prev, skips, params["blocks"][index],
                                  emit_post)
        if emit_post:
            post, inp = res
            outputs[index] = post                  # mirror torch in-place `inp +=`
        else:
            inp = res
        skip_index += index
        outputs.append(inp)
    return jnp.transpose(inp, (0, 2, 1))           # NTC -> NCT


# ----------------------------------------------------------------------------
# Plain-JAX reference (faithful to the PyTorch module, for validation only)
# ----------------------------------------------------------------------------
def scale_linear_ref(x, p):
    y = jnp.einsum("ntc,cd->ntd", x, p["w"], precision=lax.Precision.HIGHEST)
    return (y + p["b"][None]) * p["s"][0]


def conv1d_block_ref(x, p):
    N, T, C = x.shape
    d = int(p["dilation"])
    sc = p["sc"]
    y = jnp.einsum("ntc,ch->nth", x, p["w1"], precision=lax.Precision.HIGHEST)
    y = (y + p["b1"][None]) * sc[0]
    y = jnp.where(y >= 0, y, sc[2] * y)
    m = jnp.mean(y, axis=(0, 1), keepdims=True)
    v = jnp.mean((y - m) ** 2, axis=(0, 1), keepdims=True)
    y = (y - m) / jnp.sqrt(v + EPS) * p["g1"][None] + p["be1"][None]
    zp = jnp.pad(y, ((0, 0), (d, d), (0, 0)))
    u = (p["wd"][0][None, None, :] * zp[:, :T, :]
         + p["wd"][1][None, None, :] * zp[:, d:d + T, :]
         + p["wd"][2][None, None, :] * zp[:, 2 * d:2 * d + T, :]
         + p["bd"][None])
    u = jnp.where(u >= 0, u, sc[3] * u)
    m2 = jnp.mean(u, axis=(0, 1), keepdims=True)
    v2 = jnp.mean((u - m2) ** 2, axis=(0, 1), keepdims=True)
    u = (u - m2) / jnp.sqrt(v2 + EPS) * p["g2"][None] + p["be2"][None]
    w = jnp.einsum("nth,hc->ntc", u, p["w2"], precision=lax.Precision.HIGHEST)
    return (w + p["b2"][None]) * sc[1] + x


def conv1d_repeat_forward_ref(x_nct, params, num_repeats, blocks_per_repeat):
    inp = jnp.transpose(x_nct, (0, 2, 1))
    tot = num_repeats * (num_repeats - 1) // 2
    outputs = [inp]
    skip_index = 0
    for index in range(num_repeats):
        for i in range(tot):
            if skip_index <= i < skip_index + index:
                inp = inp + scale_linear_ref(outputs[i - skip_index],
                                             params["skips"][i])
        outputs[index] = inp                       # mirror torch in-place `inp +=`
        skip_index += index
        for n in range(blocks_per_repeat):
            inp = conv1d_block_ref(inp, params["blocks"][index][n])
        outputs.append(inp)
    return jnp.transpose(inp, (0, 2, 1))


# ----------------------------------------------------------------------------
# Deterministic parameter init (shapes follow the PyTorch module __init__)
# ----------------------------------------------------------------------------
def init_params(key, C, H, K, num_repeats, blocks_per_repeat,
                scaling_param=False):
    keys = iter(jax.random.split(key, 512))
    nk = lambda: next(keys)
    params = {"blocks": [], "skips": []}
    for _ in range(num_repeats):
        rep = []
        for n in range(blocks_per_repeat):
            sp = 0.0 if scaling_param else 0.9 ** n
            scale = sp if sp else 1.0              # Parameter(sp) if sp else 1
            rep.append(dict(
                w1=jax.random.normal(nk(), (C, H), jnp.float32) / jnp.sqrt(C),
                b1=jax.random.normal(nk(), (1, H), jnp.float32) * 0.05,
                wd=jax.random.normal(nk(), (K, H), jnp.float32) * 0.3,
                bd=jax.random.normal(nk(), (1, H), jnp.float32) * 0.05,
                w2=jax.random.normal(nk(), (H, C), jnp.float32) / jnp.sqrt(H),
                b2=jax.random.normal(nk(), (1, C), jnp.float32) * 0.05,
                g1=jnp.ones((1, H), jnp.float32),    # BN1 weight
                be1=jnp.zeros((1, H), jnp.float32),  # BN1 bias
                g2=jnp.ones((1, H), jnp.float32),    # BN2 weight
                be2=jnp.zeros((1, H), jnp.float32),  # BN2 bias
                # [conv1 scale, conv2 scale, PReLU1 alpha, PReLU2 alpha]
                sc=jnp.array([scale, scale, 0.25, 0.25], jnp.float32),
                dilation=2 ** n,
            ))
        params["blocks"].append(rep)
    tot = num_repeats * (num_repeats - 1) // 2
    for _ in range(tot):
        params["skips"].append(dict(
            w=jax.random.normal(nk(), (C, C), jnp.float32) / jnp.sqrt(C),
            b=jax.random.normal(nk(), (1, C), jnp.float32) * 0.05,
            s=jnp.array([1.0], jnp.float32),
        ))
    return params


if __name__ == "__main__":
    N, C, H, T, K = 2, 16, 32, 64, 3
    num_repeats, blocks_per_repeat = 3, 2   # exercises skips + post-skip output

    key = jax.random.PRNGKey(0)
    kx, kp = jax.random.split(key)
    x = jax.random.normal(kx, (N, C, T), jnp.float32)     # N x C x T (PyTorch)
    params = init_params(kp, C, H, K, num_repeats, blocks_per_repeat)

    out = conv1d_repeat_forward(x, params, num_repeats, blocks_per_repeat)
    out = jax.block_until_ready(out)

    assert out.shape == (N, C, T)
    assert bool(jnp.all(jnp.isfinite(out)))

    ref = conv1d_repeat_forward_ref(x, params, num_repeats, blocks_per_repeat)
    ref = jax.block_until_ready(ref)
    err = float(jnp.max(jnp.abs(out - ref)))
    assert err < 2e-2, f"mismatch vs reference: {err}"

    print("KERNEL_OK")
</pallas_src>

<mosaic_0001>
module attributes {stable_mosaic.version = 11 : i64} {
  func.func @kernel(%arg0: memref<2x64x16xf32, #tpu.memory_space<vmem>>, %arg1: memref<16x32xf32, #tpu.memory_space<vmem>>, %arg2: memref<1x32xf32, #tpu.memory_space<vmem>>, %arg3: memref<3x32xf32, #tpu.memory_space<vmem>>, %arg4: memref<1x32xf32, #tpu.memory_space<vmem>>, %arg5: memref<32x16xf32, #tpu.memory_space<vmem>>, %arg6: memref<1x16xf32, #tpu.memory_space<vmem>>, %arg7: memref<1x32xf32, #tpu.memory_space<vmem>>, %arg8: memref<1x32xf32, #tpu.memory_space<vmem>>, %arg9: memref<1x32xf32, #tpu.memory_space<vmem>>, %arg10: memref<1x32xf32, #tpu.memory_space<vmem>>, %arg11: memref<16x32xf32, #tpu.memory_space<vmem>>, %arg12: memref<1x32xf32, #tpu.memory_space<vmem>>, %arg13: memref<3x32xf32, #tpu.memory_space<vmem>>, %arg14: memref<1x32xf32, #tpu.memory_space<vmem>>, %arg15: memref<32x16xf32, #tpu.memory_space<vmem>>, %arg16: memref<1x16xf32, #tpu.memory_space<vmem>>, %arg17: memref<1x32xf32, #tpu.memory_space<vmem>>, %arg18: memref<1x32xf32, #tpu.memory_space<vmem>>, %arg19: memref<1x32xf32, #tpu.memory_space<vmem>>, %arg20: memref<1x32xf32, #tpu.memory_space<vmem>>, %arg21: memref<4xf32, #tpu.memory_space<smem>>, %arg22: memref<2x64x16xf32, #tpu.memory_space<vmem>>) attributes {dimension_semantics = [], scalar_prefetch = 0 : i64, scratch_operands = 0 : i64, tpu.core_type = #tpu.core_type<tc>} {
    %c0 = arith.constant 0 : index
    %c0_0 = arith.constant 0 : index
    %c0_1 = arith.constant 0 : index
    %0 = vector.load %arg0[%c0, %c0_0, %c0_1] : memref<2x64x16xf32, #tpu.memory_space<vmem>>, vector<2x64x16xf32>
    %1 = vector.shape_cast %0 : vector<2x64x16xf32> to vector<128x16xf32>
    %2 = tpu.iota {dimensions = array<i32: 0>} : vector<128x1xi32>
    %c64_i32 = arith.constant 64 : i32
    %c0_i32 = arith.constant 0 : i32
    %3 = arith.cmpi eq, %c64_i32, %c0_i32 : i32
    %c1_i32 = arith.constant 1 : i32
    %4 = arith.select %3, %c1_i32, %c64_i32 : i32
    %5 = vector.broadcast %4 : i32 to vector<128x1xi32>
    %6 = arith.remsi %2, %5 : vector<128x1xi32>
    %c0_i32_2 = arith.constant 0 : i32
    %7 = vector.broadcast %c0_i32_2 : i32 to vector<128x1xi32>
    %8 = arith.cmpi ne, %6, %7 : vector<128x1xi32>
    %c0_i32_3 = arith.constant 0 : i32
    %9 = vector.broadcast %c0_i32_3 : i32 to vector<128x1xi32>
    %10 = arith.cmpi slt, %6, %9 : vector<128x1xi32>
    %c0_i32_4 = arith.constant 0 : i32
    %11 = arith.cmpi slt, %4, %c0_i32_4 : i32
    %12 = vector.broadcast %11 : i1 to vector<128x1xi1>
    %13 = vector.broadcast %12 : vector<128x1xi1> to vector<128x1xi1>
    %14 = arith.xori %10, %13 : vector<128x1xi1>
    %15 = arith.andi %14, %8 : vector<128x1xi1>
    %16 = vector.broadcast %4 : i32 to vector<128x1xi32>
    %17 = arith.addi %6, %16 : vector<128x1xi32>
    %18 = arith.select %15, %17, %6 : vector<128x1xi1>, vector<128x1xi32>
    %c0_5 = arith.constant 0 : index
    %19 = memref.load %arg21[%c0_5] : memref<4xf32, #tpu.memory_space<smem>>
    %c1 = arith.constant 1 : index
    %20 = memref.load %arg21[%c1] : memref<4xf32, #tpu.memory_space<smem>>
    %c0_6 = arith.constant 0 : index
    %c0_7 = arith.constant 0 : index
    %21 = vector.load %arg1[%c0_6, %c0_7] : memref<16x32xf32, #tpu.memory_space<vmem>>, vector<16x32xf32>
    %cst = arith.constant dense<0.000000e+00> : vector<128x32xf32>
    %22 = tpu.matmul %1, %21, %cst {dimension_numbers = #tpu.dot_dimension_numbers<[1], [0], [0], [1], [0, 0, 1, 1], [], []>} : vector<128x16xf32>, vector<16x32xf32>, vector<128x32xf32> -> vector<128x32xf32>
    %c0_8 = arith.constant 0 : index
    %c0_9 = arith.constant 0 : index
    %23 = vector.load %arg2[%c0_8, %c0_9] : memref<1x32xf32, #tpu.memory_space<vmem>>, vector<1x32xf32>
    %24 = vector.broadcast %23 : vector<1x32xf32> to vector<128x32xf32>
    %25 = arith.addf %22, %24 : vector<128x32xf32>
    %cst_10 = arith.constant 0.000000e+00 : f32
    %26 = vector.broadcast %cst_10 : f32 to vector<128x32xf32>
    %27 = arith.cmpf oge, %25, %26 : vector<128x32xf32>
    %28 = vector.broadcast %19 : f32 to vector<128x32xf32>
    %29 = arith.mulf %28, %25 : vector<128x32xf32>
    %30 = arith.select %27, %25, %29 : vector<128x32xi1>, vector<128x32xf32>
    %cst_11 = arith.constant dense<0.000000e+00> : vector<32xf32>
    %31 = vector.multi_reduction <add>, %30, %cst_11 [0] : vector<128x32xf32> to vector<32xf32>
    %32 = vector.shape_cast %31 : vector<32xf32> to vector<1x32xf32>
    %cst_12 = arith.constant 7.812500e-03 : f32
    %33 = vector.broadcast %cst_12 : f32 to vector<1x32xf32>
    %34 = arith.mulf %32, %33 : vector<1x32xf32>
    %35 = arith.mulf %30, %30 : vector<128x32xf32>
    %cst_13 = arith.constant dense<0.000000e+00> : vector<32xf32>
    %36 = vector.multi_reduction <add>, %35, %cst_13 [0] : vector<128x32xf32> to vector<32xf32>
    %37 = vector.shape_cast %36 : vector<32xf32> to vector<1x32xf32>
    %cst_14 = arith.constant 7.812500e-03 : f32
    %38 = vector.broadcast %cst_14 : f32 to vector<1x32xf32>
    %39 = arith.mulf %37, %38 : vector<1x32xf32>
    %40 = arith.mulf %34, %34 : vector<1x32xf32>
    %41 = arith.subf %39, %40 : vector<1x32xf32>
    %cst_15 = arith.constant 0.000000e+00 : f32
    %42 = vector.broadcast %cst_15 : f32 to vector<1x32xf32>
    %43 = arith.maximumf %41, %42 : vector<1x32xf32>
    %44 = vector.broadcast %34 : vector<1x32xf32> to vector<128x32xf32>
    %45 = arith.subf %30, %44 : vector<128x32xf32>
    %cst_16 = arith.constant 9.99999974E-6 : f32
    %46 = vector.broadcast %cst_16 : f32 to vector<1x32xf32>
    %47 = arith.addf %43, %46 : vector<1x32xf32>
    %48 = math.rsqrt %47 : vector<1x32xf32>
    %c0_17 = arith.constant 0 : index
    %c0_18 = arith.constant 0 : index
    %49 = vector.load %arg7[%c0_17, %c0_18] : memref<1x32xf32, #tpu.memory_space<vmem>>, vector<1x32xf32>
    %50 = arith.mulf %48, %49 : vector<1x32xf32>
    %51 = vector.broadcast %50 : vector<1x32xf32> to vector<128x32xf32>
    %52 = arith.mulf %45, %51 : vector<128x32xf32>
    %c0_19 = arith.constant 0 : index
    %c0_20 = arith.constant 0 : index
    %53 = vector.load %arg8[%c0_19, %c0_20] : memref<1x32xf32, #tpu.memory_space<vmem>>, vector<1x32xf32>
    %54 = vector.broadcast %53 : vector<1x32xf32> to vector<128x32xf32>
    %55 = arith.addf %52, %54 : vector<128x32xf32>
    %c0_21 = arith.constant 0 : index
    %c0_22 = arith.constant 0 : index
    %56 = vector.load %arg3[%c0_21, %c0_22] : memref<3x32xf32, #tpu.memory_space<vmem>>, vector<3x32xf32>
    %cst_23 = arith.constant 0.000000e+00 : f32
    %57 = vector.broadcast %cst_23 : f32 to vector<1x32xf32>
    %58 = vector.extract_strided_slice %55 {offsets = [0, 0], sizes = [127, 32], strides = [1, 1]} : vector<128x32xf32> to vector<127x32xf32>
    %59 = tpu.concatenate %57, %58 in 0 : vector<1x32xf32>, vector<127x32xf32> -> vector<128x32xf32>
    %c1_i32_24 = arith.constant 1 : i32
    %60 = vector.broadcast %c1_i32_24 : i32 to vector<128x1xi32>
    %61 = arith.cmpi sge, %18, %60 : vector<128x1xi32>
    %cst_25 = arith.constant 0.000000e+00 : f32
    %62 = vector.shape_cast %61 : vector<128x1xi1> to vector<128x1xi1>
    %63 = vector.broadcast %62 : vector<128x1xi1> to vector<128x32xi1>
    %64 = vector.broadcast %cst_25 : f32 to vector<128x32xf32>
    %65 = arith.select %63, %59, %64 : vector<128x32xi1>, vector<128x32xf32>
    %66 = vector.extract_strided_slice %55 {offsets = [1, 0], sizes = [127, 32], strides = [1, 1]} : vector<128x32xf32> to vector<127x32xf32>
    %67 = tpu.concatenate %66, %57 in 0 : vector<127x32xf32>, vector<1x32xf32> -> vector<128x32xf32>
    %c63_i32 = arith.constant 63 : i32
    %68 = vector.broadcast %c63_i32 : i32 to vector<128x1xi32>
    %69 = arith.cmpi slt, %18, %68 : vector<128x1xi32>
    %cst_26 = arith.constant 0.000000e+00 : f32
    %70 = vector.shape_cast %69 : vector<128x1xi1> to vector<128x1xi1>
    %71 = vector.broadcast %70 : vector<128x1xi1> to vector<128x32xi1>
    %72 = vector.broadcast %cst_26 : f32 to vector<128x32xf32>
    %73 = arith.select %71, %67, %72 : vector<128x32xi1>, vector<128x32xf32>
    %74 = vector.extract_strided_slice %56 {offsets = [0, 0], sizes = [1, 32], strides = [1, 1]} : vector<3x32xf32> to vector<1x32xf32>
    %75 = vector.broadcast %74 : vector<1x32xf32> to vector<128x32xf32>
    %76 = arith.mulf %75, %65 : vector<128x32xf32>
    %77 = vector.extract_strided_slice %56 {offsets = [1, 0], sizes = [1, 32], strides = [1, 1]} : vector<3x32xf32> to vector<1x32xf32>
    %78 = vector.broadcast %77 : vector<1x32xf32> to vector<128x32xf32>
    %79 = arith.mulf %78, %55 : vector<128x32xf32>
    %80 = arith.addf %76, %79 : vector<128x32xf32>
    %81 = vector.extract_strided_slice %56 {offsets = [2, 0], sizes = [1, 32], strides = [1, 1]} : vector<3x32xf32> to vector<1x32xf32>
    %82 = vector.broadcast %81 : vector<1x32xf32> to vector<128x32xf32>
    %83 = arith.mulf %82, %73 : vector<128x32xf32>
    %84 = arith.addf %80, %83 : vector<128x32xf32>
    %c0_27 = arith.constant 0 : index
    %c0_28 = arith.constant 0 : index
    %85 = vector.load %arg4[%c0_27, %c0_28] : memref<1x32xf32, #tpu.memory_space<vmem>>, vector<1x32xf32>
    %86 = vector.broadcast %85 : vector<1x32xf32> to vector<128x32xf32>
    %87 = arith.addf %84, %86 : vector<128x32xf32>
    %cst_29 = arith.constant 0.000000e+00 : f32
    %88 = vector.broadcast %cst_29 : f32 to vector<128x32xf32>
    %89 = arith.cmpf oge, %87, %88 : vector<128x32xf32>
    %90 = vector.broadcast %20 : f32 to vector<128x32xf32>
    %91 = arith.mulf %90, %87 : vector<128x32xf32>
    %92 = arith.select %89, %87, %91 : vector<128x32xi1>, vector<128x32xf32>
    %cst_30 = arith.constant dense<0.000000e+00> : vector<32xf32>
    %93 = vector.multi_reduction <add>, %92, %cst_30 [0] : vector<128x32xf32> to vector<32xf32>
    %94 = vector.shape_cast %93 : vector<32xf32> to vector<1x32xf32>
    %cst_31 = arith.constant 7.812500e-03 : f32
    %95 = vector.broadcast %cst_31 : f32 to vector<1x32xf32>
    %96 = arith.mulf %94, %95 : vector<1x32xf32>
    %97 = arith.mulf %92, %92 : vector<128x32xf32>
    %cst_32 = arith.constant dense<0.000000e+00> : vector<32xf32>
    %98 = vector.multi_reduction <add>, %97, %cst_32 [0] : vector<128x32xf32> to vector<32xf32>
    %99 = vector.shape_cast %98 : vector<32xf32> to vector<1x32xf32>
    %cst_33 = arith.constant 7.812500e-03 : f32
    %100 = vector.broadcast %cst_33 : f32 to vector<1x32xf32>
    %101 = arith.mulf %99, %100 : vector<1x32xf32>
    %102 = arith.mulf %96, %96 : vector<1x32xf32>
    %103 = arith.subf %101, %102 : vector<1x32xf32>
    %cst_34 = arith.constant 0.000000e+00 : f32
    %104 = vector.broadcast %cst_34 : f32 to vector<1x32xf32>
    %105 = arith.maximumf %103, %104 : vector<1x32xf32>
    %106 = vector.broadcast %96 : vector<1x32xf32> to vector<128x32xf32>
    %107 = arith.subf %92, %106 : vector<128x32xf32>
    %cst_35 = arith.constant 9.99999974E-6 : f32
    %108 = vector.broadcast %cst_35 : f32 to vector<1x32xf32>
    %109 = arith.addf %105, %108 : vector<1x32xf32>
    %110 = math.rsqrt %109 : vector<1x32xf32>
    %c0_36 = arith.constant 0 : index
    %c0_37 = arith.constant 0 : index
    %111 = vector.load %arg9[%c0_36, %c0_37] : memref<1x32xf32, #tpu.memory_space<vmem>>, vector<1x32xf32>
    %112 = arith.mulf %110, %111 : vector<1x32xf32>
    %113 = vector.broadcast %112 : vector<1x32xf32> to vector<128x32xf32>
    %114 = arith.mulf %107, %113 : vector<128x32xf32>
    %c0_38 = arith.constant 0 : index
    %c0_39 = arith.constant 0 : index
    %115 = vector.load %arg10[%c0_38, %c0_39] : memref<1x32xf32, #tpu.memory_space<vmem>>, vector<1x32xf32>
    %116 = vector.broadcast %115 : vector<1x32xf32> to vector<128x32xf32>
    %117 = arith.addf %114, %116 : vector<128x32xf32>
    %c0_40 = arith.constant 0 : index
    %c0_41 = arith.constant 0 : index
    %118 = vector.load %arg5[%c0_40, %c0_41] : memref<32x16xf32, #tpu.memory_space<vmem>>, vector<32x16xf32>
    %cst_42 = arith.constant dense<0.000000e+00> : vector<128x16xf32>
    %119 = tpu.matmul %117, %118, %cst_42 {dimension_numbers = #tpu.dot_dimension_numbers<[1], [0], [0], [1], [0, 0, 1, 1], [], []>} : vector<128x32xf32>, vector<32x16xf32>, vector<128x16xf32> -> vector<128x16xf32>
    %120 = arith.addf %1, %119 : vector<128x16xf32>
    %c0_43 = arith.constant 0 : index
    %c0_44 = arith.constant 0 : index
    %121 = vector.load %arg6[%c0_43, %c0_44] : memref<1x16xf32, #tpu.memory_space<vmem>>, vector<1x16xf32>
    %122 = vector.broadcast %121 : vector<1x16xf32> to vector<128x16xf32>
    %123 = arith.addf %120, %122 : vector<128x16xf32>
    %c2 = arith.constant 2 : index
    %124 = memref.load %arg21[%c2] : memref<4xf32, #tpu.memory_space<smem>>
    %c3 = arith.constant 3 : index
    %125 = memref.load %arg21[%c3] : memref<4xf32, #tpu.memory_space<smem>>
    %c0_45 = arith.constant 0 : index
    %c0_46 = arith.constant 0 : index
    %126 = vector.load %arg11[%c0_45, %c0_46] : memref<16x32xf32, #tpu.memory_space<vmem>>, vector<16x32xf32>
    %cst_47 = arith.constant dense<0.000000e+00> : vector<128x32xf32>
    %127 = tpu.matmul %123, %126, %cst_47 {dimension_numbers = #tpu.dot_dimension_numbers<[1], [0], [0], [1], [0, 0, 1, 1], [], []>} : vector<128x16xf32>, vector<16x32xf32>, vector<128x32xf32> -> vector<128x32xf32>
    %c0_48 = arith.constant 0 : index
    %c0_49 = arith.constant 0 : index
    %128 = vector.load %arg12[%c0_48, %c0_49] : memref<1x32xf32, #tpu.memory_space<vmem>>, vector<1x32xf32>
    %129 = vector.broadcast %128 : vector<1x32xf32> to vector<128x32xf32>
    %130 = arith.addf %127, %129 : vector<128x32xf32>
    %cst_50 = arith.constant 0.000000e+00 : f32
    %131 = vector.broadcast %cst_50 : f32 to vector<128x32xf32>
    %132 = arith.cmpf oge, %130, %131 : vector<128x32xf32>
    %133 = vector.broadcast %124 : f32 to vector<128x32xf32>
    %134 = arith.mulf %133, %130 : vector<128x32xf32>
    %135 = arith.select %132, %130, %134 : vector<128x32xi1>, vector<128x32xf32>
    %cst_51 = arith.constant dense<0.000000e+00> : vector<32xf32>
    %136 = vector.multi_reduction <add>, %135, %cst_51 [0] : vector<128x32xf32> to vector<32xf32>
    %137 = vector.shape_cast %136 : vector<32xf32> to vector<1x32xf32>
    %cst_52 = arith.constant 7.812500e-03 : f32
    %138 = vector.broadcast %cst_52 : f32 to vector<1x32xf32>
    %139 = arith.mulf %137, %138 : vector<1x32xf32>
    %140 = arith.mulf %135, %135 : vector<128x32xf32>
    %cst_53 = arith.constant dense<0.000000e+00> : vector<32xf32>
    %141 = vector.multi_reduction <add>, %140, %cst_53 [0] : vector<128x32xf32> to vector<32xf32>
    %142 = vector.shape_cast %141 : vector<32xf32> to vector<1x32xf32>
    %cst_54 = arith.constant 7.812500e-03 : f32
    %143 = vector.broadcast %cst_54 : f32 to vector<1x32xf32>
    %144 = arith.mulf %142, %143 : vector<1x32xf32>
    %145 = arith.mulf %139, %139 : vector<1x32xf32>
    %146 = arith.subf %144, %145 : vector<1x32xf32>
    %cst_55 = arith.constant 0.000000e+00 : f32
    %147 = vector.broadcast %cst_55 : f32 to vector<1x32xf32>
    %148 = arith.maximumf %146, %147 : vector<1x32xf32>
    %149 = vector.broadcast %139 : vector<1x32xf32> to vector<128x32xf32>
    %150 = arith.subf %135, %149 : vector<128x32xf32>
    %cst_56 = arith.constant 9.99999974E-6 : f32
    %151 = vector.broadcast %cst_56 : f32 to vector<1x32xf32>
    %152 = arith.addf %148, %151 : vector<1x32xf32>
    %153 = math.rsqrt %152 : vector<1x32xf32>
    %c0_57 = arith.constant 0 : index
    %c0_58 = arith.constant 0 : index
    %154 = vector.load %arg17[%c0_57, %c0_58] : memref<1x32xf32, #tpu.memory_space<vmem>>, vector<1x32xf32>
    %155 = arith.mulf %153, %154 : vector<1x32xf32>
    %156 = vector.broadcast %155 : vector<1x32xf32> to vector<128x32xf32>
    %157 = arith.mulf %150, %156 : vector<128x32xf32>
    %c0_59 = arith.constant 0 : index
    %c0_60 = arith.constant 0 : index
    %158 = vector.load %arg18[%c0_59, %c0_60] : memref<1x32xf32, #tpu.memory_space<vmem>>, vector<1x32xf32>
    %159 = vector.broadcast %158 : vector<1x32xf32> to vector<128x32xf32>
    %160 = arith.addf %157, %159 : vector<128x32xf32>
    %c0_61 = arith.constant 0 : index
    %c0_62 = arith.constant 0 : index
    %161 = vector.load %arg13[%c0_61, %c0_62] : memref<3x32xf32, #tpu.memory_space<vmem>>, vector<3x32xf32>
    %cst_63 = arith.constant 0.000000e+00 : f32
    %162 = vector.broadcast %cst_63 : f32 to vector<2x32xf32>
    %163 = vector.extract_strided_slice %160 {offsets = [0, 0], sizes = [126, 32], strides = [1, 1]} : vector<128x32xf32> to vector<126x32xf32>
    %164 = tpu.concatenate %162, %163 in 0 : vector<2x32xf32>, vector<126x32xf32> -> vector<128x32xf32>
    %c2_i32 = arith.constant 2 : i32
    %165 = vector.broadcast %c2_i32 : i32 to vector<128x1xi32>
    %166 = arith.cmpi sge, %18, %165 : vector<128x1xi32>
    %cst_64 = arith.constant 0.000000e+00 : f32
    %167 = vector.shape_cast %166 : vector<128x1xi1> to vector<128x1xi1>
    %168 = vector.broadcast %167 : vector<128x1xi1> to vector<128x32xi1>
    %169 = vector.broadcast %cst_64 : f32 to vector<128x32xf32>
    %170 = arith.select %168, %164, %169 : vector<128x32xi1>, vector<128x32xf32>
    %171 = vector.extract_strided_slice %160 {offsets = [2, 0], sizes = [126, 32], strides = [1, 1]} : vector<128x32xf32> to vector<126x32xf32>
    %172 = tpu.concatenate %171, %162 in 0 : vector<126x32xf32>, vector<2x32xf32> -> vector<128x32xf32>
    %c62_i32 = arith.constant 62 : i32
    %173 = vector.broadcast %c62_i32 : i32 to vector<128x1xi32>
    %174 = arith.cmpi slt, %18, %173 : vector<128x1xi32>
    %cst_65 = arith.constant 0.000000e+00 : f32
    %175 = vector.shape_cast %174 : vector<128x1xi1> to vector<128x1xi1>
    %176 = vector.broadcast %175 : vector<128x1xi1> to vector<128x32xi1>
    %177 = vector.broadcast %cst_65 : f32 to vector<128x32xf32>
    %178 = arith.select %176, %172, %177 : vector<128x32xi1>, vector<128x32xf32>
    %179 = vector.extract_strided_slice %161 {offsets = [0, 0], sizes = [1, 32], strides = [1, 1]} : vector<3x32xf32> to vector<1x32xf32>
    %180 = vector.broadcast %179 : vector<1x32xf32> to vector<128x32xf32>
    %181 = arith.mulf %180, %170 : vector<128x32xf32>
    %182 = vector.extract_strided_slice %161 {offsets = [1, 0], sizes = [1, 32], strides = [1, 1]} : vector<3x32xf32> to vector<1x32xf32>
    %183 = vector.broadcast %182 : vector<1x32xf32> to vector<128x32xf32>
    %184 = arith.mulf %183, %160 : vector<128x32xf32>
    %185 = arith.addf %181, %184 : vector<128x32xf32>
    %186 = vector.extract_strided_slice %161 {offsets = [2, 0], sizes = [1, 32], strides = [1, 1]} : vector<3x32xf32> to vector<1x32xf32>
    %187 = vector.broadcast %186 : vector<1x32xf32> to vector<128x32xf32>
    %188 = arith.mulf %187, %178 : vector<128x32xf32>
    %189 = arith.addf %185, %188 : vector<128x32xf32>
    %c0_66 = arith.constant 0 : index
    %c0_67 = arith.constant 0 : index
    %190 = vector.load %arg14[%c0_66, %c0_67] : memref<1x32xf32, #tpu.memory_space<vmem>>, vector<1x32xf32>
    %191 = vector.broadcast %190 : vector<1x32xf32> to vector<128x32xf32>
    %192 = arith.addf %189, %191 : vector<128x32xf32>
    %cst_68 = arith.constant 0.000000e+00 : f32
    %193 = vector.broadcast %cst_68 : f32 to vector<128x32xf32>
    %194 = arith.cmpf oge, %192, %193 : vector<128x32xf32>
    %195 = vector.broadcast %125 : f32 to vector<128x32xf32>
    %196 = arith.mulf %195, %192 : vector<128x32xf32>
    %197 = arith.select %194, %192, %196 : vector<128x32xi1>, vector<128x32xf32>
    %cst_69 = arith.constant dense<0.000000e+00> : vector<32xf32>
    %198 = vector.multi_reduction <add>, %197, %cst_69 [0] : vector<128x32xf32> to vector<32xf32>
    %199 = vector.shape_cast %198 : vector<32xf32> to vector<1x32xf32>
    %cst_70 = arith.constant 7.812500e-03 : f32
    %200 = vector.broadcast %cst_70 : f32 to vector<1x32xf32>
    %201 = arith.mulf %199, %200 : vector<1x32xf32>
    %202 = arith.mulf %197, %197 : vector<128x32xf32>
    %cst_71 = arith.constant dense<0.000000e+00> : vector<32xf32>
    %203 = vector.multi_reduction <add>, %202, %cst_71 [0] : vector<128x32xf32> to vector<32xf32>
    %204 = vector.shape_cast %203 : vector<32xf32> to vector<1x32xf32>
    %cst_72 = arith.constant 7.812500e-03 : f32
    %205 = vector.broadcast %cst_72 : f32 to vector<1x32xf32>
    %206 = arith.mulf %204, %205 : vector<1x32xf32>
    %207 = arith.mulf %201, %201 : vector<1x32xf32>
    %208 = arith.subf %206, %207 : vector<1x32xf32>
    %cst_73 = arith.constant 0.000000e+00 : f32
    %209 = vector.broadcast %cst_73 : f32 to vector<1x32xf32>
    %210 = arith.maximumf %208, %209 : vector<1x32xf32>
    %211 = vector.broadcast %201 : vector<1x32xf32> to vector<128x32xf32>
    %212 = arith.subf %197, %211 : vector<128x32xf32>
    %cst_74 = arith.constant 9.99999974E-6 : f32
    %213 = vector.broadcast %cst_74 : f32 to vector<1x32xf32>
    %214 = arith.addf %210, %213 : vector<1x32xf32>
    %215 = math.rsqrt %214 : vector<1x32xf32>
    %c0_75 = arith.constant 0 : index
    %c0_76 = arith.constant 0 : index
    %216 = vector.load %arg19[%c0_75, %c0_76] : memref<1x32xf32, #tpu.memory_space<vmem>>, vector<1x32xf32>
    %217 = arith.mulf %215, %216 : vector<1x32xf32>
    %218 = vector.broadcast %217 : vector<1x32xf32> to vector<128x32xf32>
    %219 = arith.mulf %212, %218 : vector<128x32xf32>
    %c0_77 = arith.constant 0 : index
    %c0_78 = arith.constant 0 : index
    %220 = vector.load %arg20[%c0_77, %c0_78] : memref<1x32xf32, #tpu.memory_space<vmem>>, vector<1x32xf32>
    %221 = vector.broadcast %220 : vector<1x32xf32> to vector<128x32xf32>
    %222 = arith.addf %219, %221 : vector<128x32xf32>
    %c0_79 = arith.constant 0 : index
    %c0_80 = arith.constant 0 : index
    %223 = vector.load %arg15[%c0_79, %c0_80] : memref<32x16xf32, #tpu.memory_space<vmem>>, vector<32x16xf32>
    %cst_81 = arith.constant dense<0.000000e+00> : vector<128x16xf32>
    %224 = tpu.matmul %222, %223, %cst_81 {dimension_numbers = #tpu.dot_dimension_numbers<[1], [0], [0], [1], [0, 0, 1, 1], [], []>} : vector<128x32xf32>, vector<32x16xf32>, vector<128x16xf32> -> vector<128x16xf32>
    %225 = arith.addf %123, %224 : vector<128x16xf32>
    %c0_82 = arith.constant 0 : index
    %c0_83 = arith.constant 0 : index
    %226 = vector.load %arg16[%c0_82, %c0_83] : memref<1x16xf32, #tpu.memory_space<vmem>>, vector<1x16xf32>
    %227 = vector.broadcast %226 : vector<1x16xf32> to vector<128x16xf32>
    %228 = arith.addf %225, %227 : vector<128x16xf32>
    %229 = vector.shape_cast %228 : vector<128x16xf32> to vector<2x64x16xf32>
    %c0_84 = arith.constant 0 : index
    %c0_85 = arith.constant 0 : index
    %c0_86 = arith.constant 0 : index
    %230 = vector.load %arg22[%c0_84, %c0_85, %c0_86] : memref<2x64x16xf32, #tpu.memory_space<vmem>>, vector<2x64x16xf32>
    tpu.vector_store %arg22[%c0_84, %c0_85, %c0_86], %229 {strides = array<i32>} : memref<2x64x16xf32, #tpu.memory_space<vmem>>, vector<2x64x16xf32>,
    return
  }
}

</mosaic_0001>

<bundles_post_ra>
// kernel: tpu_custom_call.1
= control target key start
LH: loop header
LB: loop body
LE: loop exit
PB: predicated region body
PF: predicated region fallthrough
CT: control target
= control target key end

     0   :  { %s4854_s0 = inlined_call_operand.vmem [shape: f32[2,64,16], index: 0, kind: input, shape index: {}]   ;;  %s4855_s1 = inlined_call_operand.vmem [shape: f32[16,32], index: 1, kind: input, shape index: {}]   ;;  %s4856_s2 = inlined_call_operand.vmem [shape: f32[1,32], index: 2, kind: input, shape index: {}]   ;;  %s4857_s3 = inlined_call_operand.vmem [shape: f32[3,32], index: 3, kind: input, shape index: {}]   ;;  %s4858_s4 = inlined_call_operand.vmem [shape: f32[1,32], index: 4, kind: input, shape index: {}]   ;;  %s4859_s5 = inlined_call_operand.vmem [shape: f32[32,16], index: 5, kind: input, shape index: {}]   ;;  %s4860_s6 = inlined_call_operand.vmem [shape: f32[1,16], index: 6, kind: input, shape index: {}]   ;;  %s4861_s7 = inlined_call_operand.vmem [shape: f32[1,32], index: 7, kind: input, shape index: {}]   ;;  %s4862_s8 = inlined_call_operand.vmem [shape: f32[1,32], index: 8, kind: input, shape index: {}]   ;;  %s4863_s9 = inlined_call_operand.vmem [shape: f32[1,32], index: 9, kind: input, shape index: {}]   ;;  %s4864_s10 = inlined_call_operand.vmem [shape: f32[1,32], index: 10, kind: input, shape index: {}]   ;;  %s4865_s11 = inlined_call_operand.vmem [shape: f32[16,32], index: 11, kind: input, shape index: {}]   ;;  %s4866_s12 = inlined_call_operand.vmem [shape: f32[1,32], index: 12, kind: input, shape index: {}]   ;;  %s4867_s13 = inlined_call_operand.vmem [shape: f32[3,32], index: 13, kind: input, shape index: {}]   ;;  %s4868_s14 = inlined_call_operand.vmem [shape: f32[1,32], index: 14, kind: input, shape index: {}]   ;;  %s4869_s15 = inlined_call_operand.vmem [shape: f32[32,16], index: 15, kind: input, shape index: {}]   ;;  %s4870_s16 = inlined_call_operand.vmem [shape: f32[1,16], index: 16, kind: input, shape index: {}]   ;;  %s4871_s17 = inlined_call_operand.vmem [shape: f32[1,32], index: 17, kind: input, shape index: {}]   ;;  %s4872_s18 = inlined_call_operand.vmem [shape: f32[1,32], index: 18, kind: input, shape index: {}]   ;;  %s4873_s19 = inlined_call_operand.vmem [shape: f32[1,32], index: 19, kind: input, shape index: {}]   ;;  %s4874_s20 = inlined_call_operand.vmem [shape: f32[1,32], index: 20, kind: input, shape index: {}]   ;;  %s4875_s21 = inlined_call_operand.vmem [shape: f32[4], index: 21, kind: input, shape index: {}]   ;;  %s4876_s22 = inlined_call_operand.vmem [shape: f32[2,64,16], index: 22, kind: output, shape index: {}]  }
   0x1   :  { %4895 = sst [smem:[#allocation13_spill]] %s4854_s0 }
   0x2   :  { %4896 = sst [smem:[#allocation14_spill]] %s4855_s1 }
   0x3   :  { %4897 = sst [smem:[#allocation15_spill]] %s4856_s2 }
   0x4   :  { %4898 = sst [smem:[#allocation16_spill]] %s4857_s3 }
   0x5   :  { %4899 = sst [smem:[#allocation17_spill]] %s4858_s4 }
   0x6   :  { %4900 = sst [smem:[#allocation18_spill]] %s4859_s5 }
   0x7   :  { %4901 = sst [smem:[#allocation19_spill]] %s4860_s6 }
   0x8   :  { %27 = vsyncpa [#allocation3], 0  ;;  %s76_s29 = sshll.u32 %s4875_s21, 4  ;;  %s77_s29 = int_to_ptr.vmem [resolvable:$true] %s76_s29 }
   0x9   :  { %s3078_s30 = scalar_lea.vmem %s77_s29, 16  ;;  %p3083_p1 = scmp.lt.s32.totalorder %s77_s29, %s77_s29 }
   0xa   :  { %p3079_p0 = scmp.ne.s32.totalorder %s77_s29, %s3078_s30  ;;  %p3084_p2 = scmp.lt.s32.totalorder %s3078_s30, %s3078_s30 }
   0xc   :  { %p3085_p3 = por %p3084_p2, %p3083_p1 }
   0xe   :  { %p3086_p4 = pnand %p3085_p3, %p3079_p0 }
  0x10   :  { %3089 = shalt.err (!%p3086_p4)
}
  0x11   :  { %s3092_s4 = smov [#allocation2]  }
  0x12   :  { %79 = dma.vmem_to_smem %s77_s29, 16, %s3092_s4, [#allocation3]  }
  0x13   :  { %3090 = dma.done.wait [#allocation3], 16  }
  0x14   :  { %3091 = vsyncadd [#allocation3], 4294967280 }
  0x15   :  { %83 = sfence }
  0x16   :  { %s4902_s1 = sld [smem:[#allocation14_spill]]  ;;  %s4903_s25 = sld [smem:[#allocation13_spill]]  ;;  %vm320_vm0 = vcmask 130048   ;;  %vm563_vm2 = vcmask 261120  }
  0x17   :  { %s4904_s27 = sld [smem:[#allocation18_spill]]  ;;  %s309_s23 = sld [smem:[#allocation2]] }
  0x18   :  { %s4905_s24 = sld [smem:[#allocation15_spill]]  ;;  %s4915_s30 = sld [smem:[#allocation17_spill]] }
  0x19   :  { %s4916_s2 = sld [smem:[#allocation19_spill]]  ;;  %s2794_s6 = sld [smem:[#allocation2 + $0x2]] }
  0x1c   :  { %v311_v0 = vld [vmem:[%s4902_s1] sm:$0xff]  ;;  %v312_v1 = vld [vmem:[%s4902_s1 + $0x8] sm:$0xff]  ;;  %v86_v5 = vld [vmem:[%s4903_s25 + $0x10] sm:$0xff] }
  0x1d   :  { %v84_v2 = vld [vmem:[%s4903_s25] sm:$0xff]  ;;  %v3029_v3 = vpack.c.bf16 %v312_v1, %v311_v0  ;;  %v85_v4 = vld [vmem:[%s4903_s25 + $0x8] sm:$0xff]  ;;  %v87_v6 = vld [vmem:[%s4903_s25 + $0x18] sm:$0xff]  ;;  %v3298_v27 = vstv %s309_s23 }
  0x1e   :  { %2913 = vmatprep.mubr.msk.f32.mxu0 %vm320_vm0, %v84_v2  ;;  %v88_v7 = vld [vmem:[%s4903_s25 + $0x20] sm:$0xff]  ;;  %v89_v8 = vld [vmem:[%s4903_s25 + $0x28] sm:$0xff]  ;;  %v90_v9 = vld [vmem:[%s4903_s25 + $0x30] sm:$0xff] }
  0x1f   :  { %3030 = vmatprep.subr.bf16.mxu0 %v3029_v3  ;;  %v91_v10 = vld [vmem:[%s4903_s25 + $0x38] sm:$0xff]  ;;  %v92_v11 = vld [vmem:[%s4903_s25 + $0x40] sm:$0xff]  ;;  %v93_v12 = vld [vmem:[%s4903_s25 + $0x48] sm:$0xff] }
  0x20   :  { %3032 = vmatpush3.bf16.msra.mxu0 %v3029_v3  ;;  %v94_v13 = vld [vmem:[%s4903_s25 + $0x50] sm:$0xff]  ;;  %v95_v14 = vld [vmem:[%s4903_s25 + $0x58] sm:$0xff]  ;;  %v96_v15 = vld [vmem:[%s4903_s25 + $0x60] sm:$0xff] }
  0x21   :  { %v97_v16 = vld [vmem:[%s4903_s25 + $0x68] sm:$0xff]  ;;  %v98_v17 = vld [vmem:[%s4903_s25 + $0x70] sm:$0xff]  ;;  %v99_v18 = vld [vmem:[%s4903_s25 + $0x78] sm:$0xff] }
  0x22   :  { %v1287_v19 = vld [vmem:[%s4904_s27] sm:$0xff]  ;;  %v1288_v20 = vld [vmem:[%s4904_s27 + $0x8] sm:$0xff]  ;;  %v1289_v22 = vld [vmem:[%s4904_s27 + $0x10] sm:$0xff] }
  0x23   :  { %2914 = vmatmul.mubr.msk.f32.vlgmr.msra.gmra.mrb[0].mxu0 %vm320_vm0, %v85_v4  ;;  %v3033_v21 = vpack.c.bf16 %v1288_v20, %v1287_v19  ;;  %v1290_v23 = vld [vmem:[%s4904_s27 + $0x18] sm:$0xff]  ;;  %v3296_v25 = vld [vmem:[%s4905_s24] ss:$0 sm:$0xff]  ;;  %s4906_s27 = sld [smem:[#allocation16_spill]] }
  0x24   :  { %2916 = vmatprep.mubr.msk.f32.mxu0 %vm320_vm0, %v86_v5  ;;  %v3037_v24 = vpack.c.bf16 %v1290_v23, %v1289_v22 }
  0x25   :  { %3034 = vmatprep.subr.bf16.mxu1 %v3033_v21 }
  0x26   :  { %3036 = vmatpush3.bf16.msra.mxu1 %v3033_v21 }
  0x27   :  { %2917 = vmatmul.mubr.msk.f32.gmra.mrb[2].mxu0 %vm320_vm0, %v87_v6  ;;  %3038 = vmatprep.subr.bf16.mxu1 %v3037_v24 }
  0x28   :  { %2919 = vmatprep.mubr.msk.f32.mxu0 %vm320_vm0, %v88_v7 }
  0x2a   :  { %3040 = vmatpush3.bf16.msra.mxu1 %v3037_v24 }
  0x2b   :  { %2920 = vmatmul.mubr.msk.f32.gmra.mrb[4].mxu0 %vm320_vm0, %v89_v8 }
  0x2c   :  { %2922 = vmatprep.mubr.msk.f32.mxu0 %vm320_vm0, %v90_v9 }
  0x2f   :  { %2923 = vmatmul.mubr.msk.f32.gmra.mrb[6].mxu0 %vm320_vm0, %v91_v10 }
  0x30   :  { %2925 = vmatprep.mubr.msk.f32.mxu0 %vm320_vm0, %v92_v11 }
  0x33   :  { %2926 = vmatmul.mubr.msk.f32.gmra.mrb[8].mxu0 %vm320_vm0, %v93_v12 }
  0x34   :  { %2928 = vmatprep.mubr.msk.f32.mxu0 %vm320_vm0, %v94_v13 }
  0x37   :  { %2929 = vmatmul.mubr.msk.f32.gmra.mrb[10].mxu0 %vm320_vm0, %v95_v14 }
  0x38   :  { %2931 = vmatprep.mubr.msk.f32.mxu0 %vm320_vm0, %v96_v15 }
  0x3b   :  { %2932 = vmatmul.mubr.msk.f32.gmra.mrb[12].mxu0 %vm320_vm0, %v97_v16 }
  0x3c   :  { %2934 = vmatprep.mubr.msk.f32.mxu0 %vm320_vm0, %v98_v17 }
  0x3f   :  { %2935 = vmatmul.mubr.msk.f32.gmra.mrb[14].mxu0 %vm320_vm0, %v99_v18 }
  0xf6   :  { %v2915_v26 = vpop.f32.mrb[0].mxu0 }
  0xf7   :  { %v441_v28 = vadd.f32 %v2915_v26, %v3296_v25  ;;  %v435_v29 = vpop.f32.mrb[1].mxu0 }
  0xf8   :  { %v436_v30 = vadd.f32 %v3296_v25, %v435_v29 }
  0xf9   :  { %vm515_vm1 = vcmp.ge.f32.partialorder %v441_v28, 0.0  ;;  %v532_v31 = vmul.f32 %v3298_v27, %v441_v28 }
  0xfa   :  { %vm514_vm3 = vcmp.ge.f32.partialorder %v436_v30, 0.0  ;;  %v531_v32 = vmul.f32 %v3298_v27, %v436_v30  ;;  %v2918_v33 = vpop.f32.mrb[2].mxu0 }
  0xfb   :  { %v3304_v34 = vsel %vm515_vm1, %v441_v28, %v532_v31  ;;  %v451_v35 = vadd.f32 %v2918_v33, %v3296_v25  ;;  %v445_v36 = vpop.f32.mrb[3].mxu0 }
  0xfc   :  { %v565_v37 = vsel %vm563_vm2, %v3304_v34, 0.0  ;;  %v603_v38 = vmul.f32 %v3304_v34, %v3304_v34  ;;  %v3311_v39 = vsel %vm514_vm3, %v436_v30, %v531_v32  ;;  %v446_v40 = vadd.f32 %v3296_v25, %v445_v36 }
  0xfd   :  { %v564_v41 = vsel %vm563_vm2, %v3311_v39, 0.0  ;;  %v602_v42 = vmul.f32 %v3311_v39, %v3311_v39  ;;  %vm517_vm4 = vcmp.ge.f32.partialorder %v451_v35, 0.0  ;;  %v534_v43 = vmul.f32 %v3298_v27, %v451_v35 }
  0xfe   :  { %v619_v44 = vsel %vm563_vm2, %v603_v38, 0.0  ;;  %v566_v45 = vadd.f32 %v565_v37, %v564_v41  ;;  %vm516_vm5 = vcmp.ge.f32.partialorder %v446_v40, 0.0  ;;  %v533_v46 = vmul.f32 %v3298_v27, %v446_v40  ;;  %v2921_v47 = vpop.f32.mrb[4].mxu0 }
  0xff   :  { %v618_v48 = vsel %vm563_vm2, %v602_v42, 0.0  ;;  %v3322_v49 = vsel %vm517_vm4, %v451_v35, %v534_v43  ;;  %v461_v50 = vadd.f32 %v2921_v47, %v3296_v25  ;;  %v455_v51 = vpop.f32.mrb[5].mxu0  ;;  %vm739_vm4 = vcmask 1040384  }
 0x100   :  { %v620_v52 = vadd.f32 %v619_v44, %v618_v48  ;;  %v605_v53 = vmul.f32 %v3322_v49, %v3322_v49  ;;  %v3327_v54 = vsel %vm516_vm5, %v446_v40, %v533_v46  ;;  %v456_v59 = vadd.f32 %v3296_v25, %v455_v51 }
 0x101   :  { %v567_v55 = vsel %vm563_vm2, %v3327_v54, 0.0  ;;  %v604_v56 = vmul.f32 %v3327_v54, %v3327_v54  ;;  %vm519_vm6 = vcmp.ge.f32.partialorder %v461_v50, 0.0  ;;  %v536_v57 = vmul.f32 %v3298_v27, %v461_v50 }
 0x102   :  { %v568_v58 = vadd.f32 %v567_v55, %v566_v45  ;;  %v2924_v60 = vpop.f32.mrb[6].mxu0  ;;  %v569_v1 = vsel %vm563_vm2, %v3322_v49, 0.0  ;;  %v623_v2 = vsel %vm563_vm2, %v605_v53, 0.0  ;;  %vm518_vm7 = vcmp.ge.f32.partialorder %v456_v59, 0.0 }
 0x103   :  { %v621_v61 = vsel %vm563_vm2, %v604_v56, 0.0  ;;  %v3336_v62 = vsel %vm519_vm6, %v461_v50, %v536_v57  ;;  %v471_v63 = vadd.f32 %v2924_v60, %v3296_v25  ;;  %v465_v0 = vpop.f32.mrb[7].mxu0  ;;  %v535_v4 = vmul.f32 %v3298_v27, %v456_v59 }
 0x104   :  { %v622_v3 = vadd.f32 %v621_v61, %v620_v52  ;;  %v570_v5 = vadd.f32 %v569_v1, %v568_v58  ;;  %v607_v7 = vmul.f32 %v3336_v62, %v3336_v62  ;;  %v466_v9 = vadd.f32 %v3296_v25, %v465_v0 }
 0x105   :  { %vm521_vm8 = vcmp.ge.f32.partialorder %v471_v63, 0.0  ;;  %v538_v6 = vmul.f32 %v3298_v27, %v471_v63  ;;  %v3347_v11 = vsel %vm518_vm7, %v456_v59, %v535_v4  ;;  %v573_v15 = vsel %vm563_vm2, %v3336_v62, 0.0 }
 0x106   :  { %v624_v8 = vadd.f32 %v623_v2, %v622_v3  ;;  %v2927_v10 = vpop.f32.mrb[8].mxu0  ;;  %v571_v16 = vsel %vm563_vm2, %v3347_v11, 0.0  ;;  %v606_v17 = vmul.f32 %v3347_v11, %v3347_v11  ;;  %vm520_vm9 = vcmp.ge.f32.partialorder %v466_v9, 0.0 }
 0x107   :  { %v3349_v12 = vsel %vm521_vm8, %v471_v63, %v538_v6  ;;  %v481_v13 = vadd.f32 %v2927_v10, %v3296_v25  ;;  %v475_v14 = vpop.f32.mrb[9].mxu0  ;;  %v572_v19 = vadd.f32 %v571_v16, %v570_v5  ;;  %v537_v20 = vmul.f32 %v3298_v27, %v466_v9 }
 0x108   :  { %v609_v18 = vmul.f32 %v3349_v12, %v3349_v12  ;;  %v627_v21 = vsel %vm563_vm2, %v607_v7, 0.0  ;;  %v625_v22 = vsel %vm563_vm2, %v606_v17, 0.0  ;;  %v476_v24 = vadd.f32 %v3296_v25, %v475_v14 }
 0x109   :  { %vm523_vm10 = vcmp.ge.f32.partialorder %v481_v13, 0.0  ;;  %v540_v23 = vmul.f32 %v3298_v27, %v481_v13  ;;  %v626_v28 = vadd.f32 %v625_v22, %v624_v8  ;;  %v3365_v29 = vsel %vm520_vm9, %v466_v9, %v537_v20 }
 0x10a   :  { %v2930_v26 = vpop.f32.mrb[10].mxu0  ;;  %v574_v30 = vadd.f32 %v573_v15, %v572_v19  ;;  %v577_v33 = vsel %vm563_vm2, %v3349_v12, 0.0  ;;  %v575_v35 = vsel %vm563_vm2, %v3365_v29, 0.0  ;;  %v608_v36 = vmul.f32 %v3365_v29, %v3365_v29 }
 0x10b   :  { %v491_v31 = vadd.f32 %v2930_v26, %v3296_v25  ;;  %v485_v32 = vpop.f32.mrb[11].mxu0  ;;  %v3374_v37 = vsel %vm523_vm10, %v481_v13, %v540_v23  ;;  %v631_v38 = vsel %vm563_vm2, %v609_v18, 0.0  ;;  %v628_v41 = vadd.f32 %v627_v21, %v626_v28 }
 0x10c   :  { %v576_v40 = vadd.f32 %v575_v35, %v574_v30  ;;  %vm522_vm11 = vcmp.ge.f32.partialorder %v476_v24, 0.0  ;;  %v629_v42 = vsel %vm563_vm2, %v608_v36, 0.0  ;;  %v539_v43 = vmul.f32 %v3298_v27, %v476_v24 }
 0x10d   :  { %vm525_vm12 = vcmp.ge.f32.partialorder %v491_v31, 0.0  ;;  %v542_v44 = vmul.f32 %v3298_v27, %v491_v31  ;;  %v630_v46 = vadd.f32 %v629_v42, %v628_v41  ;;  %v611_v47 = vmul.f32 %v3374_v37, %v3374_v37 }
 0x10e   :  { %v2933_v45 = vpop.f32.mrb[12].mxu0  ;;  %v578_v48 = vadd.f32 %v577_v33, %v576_v40  ;;  %v486_v50 = vadd.f32 %v3296_v25, %v485_v32  ;;  %v3383_v52 = vsel %vm522_vm11, %v476_v24, %v539_v43  ;;  %v581_v57 = vsel %vm563_vm2, %v3374_v37, 0.0 }
 0x10f   :  { %v495_v51 = vpop.f32.mrb[13].mxu0  ;;  %v3385_v53 = vsel %vm525_vm12, %v491_v31, %v542_v44  ;;  %v501_v55 = vadd.f32 %v2933_v45, %v3296_v25  ;;  %v579_v58 = vsel %vm563_vm2, %v3383_v52, 0.0  ;;  %v610_v59 = vmul.f32 %v3383_v52, %v3383_v52 }
 0x110   :  { %v496_v56 = vadd.f32 %v3296_v25, %v495_v51  ;;  %v632_v60 = vadd.f32 %v631_v38, %v630_v46  ;;  %v580_v61 = vadd.f32 %v579_v58, %v578_v48  ;;  %v613_v63 = vmul.f32 %v3385_v53, %v3385_v53 }
 0x111   :  { %vm524_vm13 = vcmp.ge.f32.partialorder %v486_v50, 0.0  ;;  %v541_v0 = vmul.f32 %v3298_v27, %v486_v50  ;;  %v635_v2 = vsel %vm563_vm2, %v611_v47, 0.0  ;;  %v633_v3 = vsel %vm563_vm2, %v610_v59, 0.0 }
 0x112   :  { %v2936_v1 = vpop.f32.mrb[14].mxu0  ;;  %vm527_vm14 = vcmp.ge.f32.partialorder %v501_v55, 0.0  ;;  %v544_v4 = vmul.f32 %v3298_v27, %v501_v55  ;;  %v634_v6 = vadd.f32 %v633_v3, %v632_v60  ;;  %v582_v8 = vadd.f32 %v581_v57, %v580_v61 }
 0x113   :  { %v505_v5 = vpop.f32.mrb[15].mxu0  ;;  %v3401_v7 = vsel %vm524_vm13, %v486_v50, %v541_v0  ;;  %vm526_vm15 = vcmp.ge.f32.partialorder %v496_v56, 0.0  ;;  %v543_v14 = vmul.f32 %v3298_v27, %v496_v56  ;;  %v585_v15 = vsel %vm563_vm2, %v3385_v53, 0.0 }
 0x114   :  { %v583_v9 = vsel %vm563_vm2, %v3401_v7, 0.0  ;;  %v612_v10 = vmul.f32 %v3401_v7, %v3401_v7  ;;  %v3407_v13 = vsel %vm527_vm14, %v501_v55, %v544_v4  ;;  %v639_v16 = vsel %vm563_vm2, %v613_v63, 0.0 }
 0x115   :  { %v584_v17 = vadd.f32 %v583_v9, %v582_v8  ;;  %v636_v18 = vadd.f32 %v635_v2, %v634_v6  ;;  %v3414_v20 = vsel %vm526_vm15, %v496_v56, %v543_v14  ;;  %v511_v21 = vadd.f32 %v2936_v1, %v3296_v25 }
 0x116   :  { %v637_v19 = vsel %vm563_vm2, %v612_v10, 0.0  ;;  %v506_v22 = vadd.f32 %v3296_v25, %v505_v5  ;;  %v615_v24 = vmul.f32 %v3407_v13, %v3407_v13  ;;  %v587_v28 = vsel %vm563_vm2, %v3414_v20, 0.0 }
 0x117   :  { %v638_v23 = vadd.f32 %v637_v19, %v636_v18  ;;  %v586_v26 = vadd.f32 %v585_v15, %v584_v17  ;;  %v614_v30 = vmul.f32 %v3414_v20, %v3414_v20  ;;  %vm529_vm1 = vcmp.ge.f32.partialorder %v511_v21, 0.0 }
 0x118   :  { %v546_v31 = vmul.f32 %v3298_v27, %v511_v21  ;;  %vm528_vm3 = vcmp.ge.f32.partialorder %v506_v22, 0.0  ;;  %v545_v35 = vmul.f32 %v3298_v27, %v506_v22  ;;  %v589_v38 = vsel %vm563_vm2, %v3407_v13, 0.0 }
 0x119   :  { %v588_v32 = vadd.f32 %v587_v28, %v586_v26  ;;  %v640_v33 = vadd.f32 %v639_v16, %v638_v23  ;;  %v641_v25 = vsel %vm563_vm2, %v614_v30, 0.0  ;;  %v643_v40 = vsel %vm563_vm2, %v615_v24, 0.0 }
 0x11a   :  { %v3427_v36 = vsel %vm529_vm1, %v511_v21, %v546_v31  ;;  %v3432_v42 = vsel %vm528_vm3, %v506_v22, %v545_v35  ;;  %v100_v28 = vlaneseq  ;;  %v677_v31 = vld [vmem:[%s4861_s7] sm:$0x1]  ;;  %vm852_vm5 = vcmask 1046528  }
 0x11b   :  { %v642_v41 = vadd.f32 %v641_v25, %v640_v33  ;;  %v617_v43 = vmul.f32 %v3427_v36, %v3427_v36  ;;  %v590_v44 = vadd.f32 %v589_v38, %v588_v32  ;;  %v591_v45 = vsel %vm563_vm2, %v3432_v42, 0.0 }
 0x11c   :  { %v616_v27 = vmul.f32 %v3432_v42, %v3432_v42  ;;  %v593_v50 = vsel %vm563_vm2, %v3427_v36, 0.0 }
 0x11d   :  { %v644_v46 = vadd.f32 %v643_v40, %v642_v41  ;;  %v592_v47 = vadd.f32 %v591_v45, %v590_v44  ;;  %v647_v55 = vsel %vm563_vm2, %v617_v43, 0.0  ;;  %v3507_v43 = vld [vmem:[%s4862_s8] ss:$0 sm:$0xff]  ;;  %s2756_s8 = sld [smem:[#allocation2 + $0x1]] }
 0x11e   :  { %v645_v48 = vsel %vm563_vm2, %v616_v27, 0.0 }
 0x11f   :  { %v646_v51 = vadd.f32 %v645_v48, %v644_v46  ;;  %v594_v56 = vadd.f32 %v593_v50, %v592_v47 }
 0x121   :  { %v648_v57 = vadd.f32 %v647_v55, %v646_v51  ;;  %v595_v58 = vrot.slane %v594_v56, 4 }
 0x123   :  { %v649_v59 = vrot.slane %v648_v57, 4  ;;  %v596_v60 = vadd.f32 %v595_v58, %v594_v56 }
 0x125   :  { %v650_v61 = vadd.f32 %v649_v59, %v648_v57  ;;  %v597_v63 = vrot.slane %v596_v60, 2 }
 0x127   :  { %v651_v0 = vrot.slane %v650_v61, 2  ;;  %v598_v1 = vadd.f32 %v597_v63, %v596_v60 }
 0x129   :  { %v652_v2 = vadd.f32 %v651_v0, %v650_v61  ;;  %v599_v3 = vrot.slane %v598_v1, 1 }
 0x12b   :  { %v653_v4 = vrot.slane %v652_v2, 1  ;;  %v600_v5 = vadd.f32 %v599_v3, %v598_v1 }
 0x12d   :  { %v654_v6 = vadd.f32 %v653_v4, %v652_v2  ;;  %v3444_v8 = vmul.f32 0.0078125, %v600_v5 }
 0x12f   :  { %v655_v9 = vmul.f32 0.0078125, %v654_v6  ;;  %v656_v10 = vmul.f32 %v3444_v8, %v3444_v8  ;;  %v670_v14 = vsub.f32 %v3385_v53, %v3444_v8  ;;  %v671_v15 = vsub.f32 %v3414_v20, %v3444_v8 }
 0x130   :  { %v672_v16 = vsub.f32 %v3407_v13, %v3444_v8  ;;  %v673_v17 = vsub.f32 %v3432_v42, %v3444_v8  ;;  %v674_v18 = vsub.f32 %v3427_v36, %v3444_v8  ;;  %v659_v19 = vsub.f32 %v3311_v39, %v3444_v8  ;;  %v722_v36 = vld [vmem:[%s4906_s27] sm:$0x7] }
 0x131   :  { %v660_v21 = vsub.f32 %v3304_v34, %v3444_v8  ;;  %v657_v22 = vsub.f32 %v655_v9, %v656_v10  ;;  %v661_v53 = vsub.f32 %v3327_v54, %v3444_v8  ;;  %v662_v20 = vsub.f32 %v3322_v49, %v3444_v8 }
 0x132   :  { %v663_v13 = vsub.f32 %v3347_v11, %v3444_v8  ;;  %v664_v23 = vsub.f32 %v3336_v62, %v3444_v8  ;;  %v665_v24 = vsub.f32 %v3365_v29, %v3444_v8  ;;  %v666_v39 = vsub.f32 %v3349_v12, %v3444_v8 }
 0x133   :  { %v667_v34 = vsub.f32 %v3383_v52, %v3444_v8  ;;  %v658_v26 = vmax.f32 %v657_v22, 0.0  ;;  %v668_v54 = vsub.f32 %v3374_v37, %v3444_v8  ;;  %v669_v49 = vsub.f32 %v3401_v7, %v3444_v8 }
 0x134   :  { %v3480_v62 = vshrl.u32 %v100_v28, 7 }
 0x135   :  { %v675_v11 = vadd.f32 1e-05, %v658_v26 }
 0x136   :  { %v3483_v30 = vadd.s32 120, %v3480_v62  ;;  %v3489_v32 = vsub.s32 0, %v3480_v62  ;;  %v987_v33 = vsub.s32 1, %v3480_v62  ;;  %v4884_v38 = vsub.s32 2, %v3480_v62 }
 0x137   :  { %3054 = vrsqrt.f32 %v675_v11  ;;  %v3594_v12 = vadd.s32 64, %v3480_v62  ;;  %v4882_v52 = vand.u32 63, %v3480_v62 }
 0x138   :  { %v4883_v25 = vand.u32 63, %v3483_v30  ;;  %v3502_v42 = vrot.slane %v722_v36, %v987_v33  ;;  %v3516_v45 = vrot.slane %v722_v36, %v3489_v32  ;;  %v3520_v27 = vrot.slane %v722_v36, %v4884_v38 }
 0x139   :  { %vm3635_vm7 = vcmp.ge.s32.totalorder %v4882_v52, 1 }
 0x13a   :  { %vm3511_vm6 = vcmp.lt.s32.totalorder %v4883_v25, 63 }
 0x141   :  { %v3055_v35 = vpop.eup %3054 }
 0x142   :  { %v678_v40 = vmul.f32 %v3055_v35, %v677_v31 }
 0x144   :  { %v3498_v41 = vrot.slane %v678_v40, %v3489_v32 }
 0x146   :  { %v694_v46 = vmul.f32 %v3498_v41, %v670_v14  ;;  %v695_v47 = vmul.f32 %v3498_v41, %v671_v15  ;;  %v696_v48 = vmul.f32 %v3498_v41, %v672_v16  ;;  %v697_v50 = vmul.f32 %v3498_v41, %v673_v17 }
 0x147   :  { %v698_v51 = vmul.f32 %v3498_v41, %v674_v18  ;;  %v683_v55 = vmul.f32 %v3498_v41, %v659_v19  ;;  %v684_v56 = vmul.f32 %v3498_v41, %v660_v21  ;;  %v685_v57 = vmul.f32 %v3498_v41, %v661_v53 }
 0x148   :  { %v3531_v58 = vadd.f32 %v3507_v43, %v694_v46  ;;  %v718_v59 = vadd.f32 %v3507_v43, %v695_v47  ;;  %v719_v60 = vadd.f32 %v3507_v43, %v696_v48  ;;  %v720_v61 = vadd.f32 %v3507_v43, %v697_v50 }
 0x149   :  { %v721_v63 = vadd.f32 %v3507_v43, %v698_v51  ;;  %v686_v0 = vmul.f32 %v3498_v41, %v662_v20  ;;  %v687_v1 = vmul.f32 %v3498_v41, %v663_v13  ;;  %v688_v2 = vmul.f32 %v3498_v41, %v664_v23 }
 0x14a   :  { %v761_v3 = vrot.slane %v3531_v58, 7  ;;  %v763_v4 = vrot.slane %v718_v59, 7  ;;  %v765_v5 = vrot.slane %v719_v60, 7  ;;  %v767_v6 = vrot.slane %v720_v61, 7 }
 0x14b   :  { %v769_v9 = vrot.slane %v721_v63, 7  ;;  %v874_v10 = vrot.slane %v3531_v58, 1  ;;  %v876_v14 = vrot.slane %v718_v59, 1  ;;  %v878_v15 = vrot.slane %v719_v60, 1 }
 0x14c   :  { %v764_v16 = vsel %vm739_vm4, %v761_v3, %v763_v4  ;;  %v766_v17 = vsel %vm739_vm4, %v763_v4, %v765_v5  ;;  %v768_v18 = vsel %vm739_vm4, %v765_v5, %v767_v6  ;;  %v880_v19 = vrot.slane %v720_v61, 1 }
 0x14d   :  { %v770_v21 = vsel %vm739_vm4, %v767_v6, %v769_v9  ;;  %v877_v22 = vsel %vm852_vm5, %v874_v10, %v876_v14  ;;  %v879_v53 = vsel %vm852_vm5, %v876_v14, %v878_v15  ;;  %v882_v20 = vrot.slane %v721_v63, 1 }
 0x14e   :  { %v881_v13 = vsel %vm852_vm5, %v878_v15, %v880_v19  ;;  %v981_v23 = vmul.f32 %v3516_v45, %v764_v16  ;;  %v982_v26 = vmul.f32 %v3516_v45, %v766_v17  ;;  %v983_v11 = vmul.f32 %v3516_v45, %v768_v18 }
 0x14f   :  { %v883_v28 = vsel %vm852_vm5, %v880_v19, %v882_v20  ;;  %v900_v31 = vsel %vm852_vm5, %v882_v20, 0.0  ;;  %v984_v35 = vmul.f32 %v3516_v45, %v770_v21  ;;  %v1001_v36 = vmul.f32 %v3502_v42, %v718_v59 }
 0x150   :  { %v964_v40 = vsel %vm3511_vm6, %v900_v31, 0.0  ;;  %v1002_v46 = vmul.f32 %v3502_v42, %v719_v60  ;;  %v1003_v47 = vmul.f32 %v3502_v42, %v720_v61  ;;  %v1004_v48 = vmul.f32 %v3502_v42, %v721_v63 }
 0x151   :  { %v1017_v50 = vadd.f32 %v1001_v36, %v981_v23  ;;  %v1037_v51 = vmul.f32 %v3520_v27, %v879_v53  ;;  %v1038_v4 = vmul.f32 %v3520_v27, %v881_v13  ;;  %v1039_v14 = vmul.f32 %v3520_v27, %v883_v28 }
 0x152   :  { %v1018_v5 = vadd.f32 %v1002_v46, %v982_v26  ;;  %v1019_v6 = vadd.f32 %v1003_v47, %v983_v11  ;;  %v1020_v9 = vadd.f32 %v1004_v48, %v984_v35  ;;  %v1040_v59 = vmul.f32 %v3520_v27, %v964_v40 }
 0x153   :  { %v3569_v44 = vadd.f32 %v1037_v51, %v1017_v50  ;;  %v689_v60 = vmul.f32 %v3498_v41, %v665_v24  ;;  %v690_v61 = vmul.f32 %v3498_v41, %v666_v39  ;;  %v691_v16 = vmul.f32 %v3498_v41, %v667_v34 }
 0x154   :  { %v3579_v63 = vadd.f32 %v1038_v4, %v1018_v5  ;;  %v3581_v15 = vadd.f32 %v1039_v14, %v1019_v6  ;;  %v692_v29 = vmul.f32 %v3498_v41, %v668_v54  ;;  %v3591_v24 = vadd.f32 %v1040_v59, %v1020_v9 }
 0x155   :  { %v693_v39 = vmul.f32 %v3498_v41, %v669_v49  ;;  %v3601_v17 = vadd.s32 56, %v3480_v62  ;;  %v4881_v34 = vand.u32 63, %v3594_v12  ;;  %v3606_v37 = vadd.f32 %v3507_v43, %v683_v55 }
 0x156   :  { %v3609_v54 = vadd.f32 %v3507_v43, %v684_v56  ;;  %v3613_v19 = vadd.f32 %v3507_v43, %v685_v57  ;;  %v3616_v7 = vadd.f32 %v3507_v43, %v686_v0  ;;  %v3619_v8 = vadd.f32 %v3507_v43, %v687_v1 }
 0x157   :  { %v4880_v18 = vand.u32 63, %v3601_v17  ;;  %v3622_v49 = vadd.f32 %v3507_v43, %v688_v2  ;;  %v3625_v41 = vadd.f32 %v3507_v43, %v689_v60  ;;  %v3628_v55 = vadd.f32 %v3507_v43, %v690_v61 }
 0x158   :  { %v3631_v56 = vadd.f32 %v3507_v43, %v691_v16  ;;  %v3640_v0 = vadd.f32 %v3507_v43, %v692_v29  ;;  %v740_v1 = vrot.slane %v3606_v37, 7  ;;  %v741_v2 = vrot.slane %v3609_v54, 7 }
 0x159   :  { %vm3646_vm8 = vcmp.ge.s32.totalorder %v4881_v34, 1  ;;  %v3651_v53 = vmul.f32 %v3520_v27, %v877_v22  ;;  %v3654_v20 = vadd.f32 %v3507_v43, %v693_v39  ;;  %v743_v13 = vrot.slane %v3613_v19, 7 }
 0x15a   :  { %v745_v23 = vrot.slane %v3616_v7, 7  ;;  %vm3660_vm9 = vcmp.lt.s32.totalorder %v4880_v18, 63  ;;  %v742_v11 = vsel %vm739_vm4, %v740_v1, %v741_v2  ;;  %v747_v28 = vrot.slane %v3619_v8, 7 }
 0x15b   :  { %v749_v22 = vrot.slane %v3622_v49, 7  ;;  %v751_v31 = vrot.slane %v3625_v41, 7  ;;  %v744_v43 = vsel %vm739_vm4, %v741_v2, %v743_v13  ;;  %v753_v36 = vrot.slane %v3628_v55, 7 }
 0x15c   :  { %v746_v35 = vsel %vm739_vm4, %v743_v13, %v745_v23  ;;  %v755_v40 = vrot.slane %v3631_v56, 7  ;;  %v748_v46 = vsel %vm739_vm4, %v745_v23, %v747_v28  ;;  %v757_v50 = vrot.slane %v3640_v0, 7 }
 0x15d   :  { %v750_v47 = vsel %vm739_vm4, %v747_v28, %v749_v22  ;;  %v752_v48 = vsel %vm739_vm4, %v749_v22, %v751_v31  ;;  %v754_v51 = vsel %vm739_vm4, %v751_v31, %v753_v36  ;;  %v759_v5 = vrot.slane %v3654_v20, 7 }
 0x15e   :  { %v756_v4 = vsel %vm739_vm4, %v753_v36, %v755_v40  ;;  %v787_v6 = vsel %vm739_vm4, 0.0, %v740_v1  ;;  %v758_v9 = vsel %vm739_vm4, %v755_v40, %v757_v50  ;;  %v853_v60 = vrot.slane %v3606_v37, 1 }
 0x15f   :  { %v836_v14 = vsel %vm3635_vm7, %v787_v6, 0.0  ;;  %v844_v59 = vsel %vm3646_vm8, %v756_v4, 0.0  ;;  %v760_v61 = vsel %vm739_vm4, %v757_v50, %v759_v5  ;;  %v762_v16 = vsel %vm739_vm4, %v759_v5, %v761_v3 }
 0x160   :  { %v854_v29 = vrot.slane %v3609_v54, 1  ;;  %v856_v39 = vrot.slane %v3613_v19, 1  ;;  %v858_v1 = vrot.slane %v3616_v7, 1  ;;  %v860_v57 = vrot.slane %v3619_v8, 1 }
 0x161   :  { %v862_v2 = vrot.slane %v3622_v49, 1  ;;  %v864_v21 = vrot.slane %v3625_v41, 1  ;;  %v866_v28 = vrot.slane %v3628_v55, 1  ;;  %v868_v3 = vrot.slane %v3631_v56, 1 }
 0x162   :  { %v855_v13 = vsel %vm852_vm5, %v853_v60, %v854_v29  ;;  %v857_v23 = vsel %vm852_vm5, %v854_v29, %v856_v39  ;;  %v859_v22 = vsel %vm852_vm5, %v856_v39, %v858_v1  ;;  %v861_v31 = vsel %vm852_vm5, %v858_v1, %v860_v57 }
 0x163   :  { %v863_v36 = vsel %vm852_vm5, %v860_v57, %v862_v2  ;;  %v865_v40 = vsel %vm852_vm5, %v862_v2, %v864_v21  ;;  %v867_v50 = vsel %vm852_vm5, %v864_v21, %v866_v28  ;;  %v869_v4 = vsel %vm852_vm5, %v866_v28, %v868_v3 }
 0x164   :  { %v870_v5 = vrot.slane %v3640_v0, 1  ;;  %v872_v6 = vrot.slane %v3654_v20, 1  ;;  %v956_v60 = vsel %vm3660_vm9, %v869_v4, 0.0  ;;  %v969_v29 = vmul.f32 %v3516_v45, %v836_v14 }
 0x165   :  { %v970_v39 = vmul.f32 %v3516_v45, %v742_v11  ;;  %v971_v1 = vmul.f32 %v3516_v45, %v744_v43  ;;  %v972_v28 = vmul.f32 %v3516_v45, %v746_v35  ;;  %v973_v18 = vmul.f32 %v3516_v45, %v748_v46 }
 0x166   :  { %v871_v57 = vsel %vm852_vm5, %v868_v3, %v870_v5  ;;  %v873_v2 = vsel %vm852_vm5, %v870_v5, %v872_v6  ;;  %v875_v21 = vsel %vm852_vm5, %v872_v6, %v874_v10  ;;  %v974_v26 = vmul.f32 %v3516_v45, %v750_v47 }
 0x167   :  { %v975_v14 = vmul.f32 %v3516_v45, %v752_v48  ;;  %v976_v11 = vmul.f32 %v3516_v45, %v754_v51  ;;  %v977_v43 = vmul.f32 %v3516_v45, %v844_v59  ;;  %v978_v3 = vmul.f32 %v3516_v45, %v758_v9 }
 0x168   :  { %v979_v4 = vmul.f32 %v3516_v45, %v760_v61  ;;  %v980_v5 = vmul.f32 %v3516_v45, %v762_v16  ;;  %v989_v10 = vmul.f32 %v3502_v42, %v3606_v37  ;;  %v990_v35 = vmul.f32 %v3502_v42, %v3609_v54 }
 0x169   :  { %v991_v46 = vmul.f32 %v3502_v42, %v3613_v19  ;;  %v992_v47 = vmul.f32 %v3502_v42, %v3616_v7  ;;  %v993_v48 = vmul.f32 %v3502_v42, %v3619_v8  ;;  %v994_v51 = vmul.f32 %v3502_v42, %v3622_v49 }
 0x16a   :  { %v995_v45 = vmul.f32 %v3502_v42, %v3625_v41  ;;  %v996_v37 = vmul.f32 %v3502_v42, %v3628_v55  ;;  %v997_v54 = vmul.f32 %v3502_v42, %v3631_v56  ;;  %v998_v19 = vmul.f32 %v3502_v42, %v3640_v0 }
 0x16b   :  { %v999_v7 = vmul.f32 %v3502_v42, %v3654_v20  ;;  %v1000_v8 = vmul.f32 %v3502_v42, %v3531_v58  ;;  %v1005_v9 = vadd.f32 %v989_v10, %v969_v29  ;;  %v1006_v49 = vadd.f32 %v990_v35, %v970_v39 }
 0x16c   :  { %v1007_v59 = vadd.f32 %v991_v46, %v971_v1  ;;  %v1008_v61 = vadd.f32 %v992_v47, %v972_v28  ;;  %v1009_v41 = vadd.f32 %v993_v48, %v973_v18  ;;  %v1010_v16 = vadd.f32 %v994_v51, %v974_v26 }
 0x16d   :  { %v1011_v6 = vadd.f32 %v995_v45, %v975_v14  ;;  %v1012_v55 = vadd.f32 %v996_v37, %v976_v11  ;;  %v1013_v34 = vadd.f32 %v997_v54, %v977_v43  ;;  %v1014_v52 = vadd.f32 %v998_v19, %v978_v3 }
 0x16e   :  { %v1015_v56 = vadd.f32 %v999_v7, %v979_v4  ;;  %v1016_v25 = vadd.f32 %v1000_v8, %v980_v5  ;;  %v1025_v0 = vmul.f32 %v3520_v27, %v855_v13  ;;  %v1026_v38 = vmul.f32 %v3520_v27, %v857_v23 }
 0x16f   :  { %v1027_v20 = vmul.f32 %v3520_v27, %v859_v22  ;;  %v1028_v42 = vmul.f32 %v3520_v27, %v861_v31  ;;  %v1029_v58 = vmul.f32 %v3520_v27, %v863_v36  ;;  %v1030_v18 = vmul.f32 %v3520_v27, %v865_v40  ;;  %v2775_v40 = vld [vmem:[%s4915_s30] ss:$0 sm:$0xff] }
 0x170   :  { %v1031_v29 = vmul.f32 %v3520_v27, %v867_v50  ;;  %v1032_v39 = vmul.f32 %v3520_v27, %v956_v60  ;;  %v1033_v1 = vmul.f32 %v3520_v27, %v871_v57  ;;  %v1034_v28 = vmul.f32 %v3520_v27, %v873_v2 }
 0x171   :  { %v1035_v13 = vmul.f32 %v3520_v27, %v875_v21  ;;  %v1041_v23 = vadd.f32 %v1025_v0, %v1005_v9  ;;  %v1042_v26 = vadd.f32 %v1026_v38, %v1006_v49  ;;  %v1043_v22 = vadd.f32 %v1027_v20, %v1007_v59 }
 0x172   :  { %v1044_v14 = vadd.f32 %v1028_v42, %v1008_v61  ;;  %v1045_v31 = vadd.f32 %v1029_v58, %v1009_v41  ;;  %v1046_v11 = vadd.f32 %v1030_v18, %v1010_v16  ;;  %v1047_v43 = vadd.f32 %v1031_v29, %v1011_v6 }
 0x173   :  { %v1048_v36 = vadd.f32 %v1032_v39, %v1012_v55  ;;  %v1049_v3 = vadd.f32 %v1033_v1, %v1013_v34  ;;  %v1050_v50 = vadd.f32 %v1034_v28, %v1014_v52  ;;  %v1051_v60 = vadd.f32 %v1035_v13, %v1015_v56 }
 0x174   :  { %v1052_v57 = vadd.f32 %v3651_v53, %v1016_v25  ;;  %v1064_v2 = vadd.f32 %v2775_v40, %v1041_v23  ;;  %v1065_v4 = vadd.f32 %v2775_v40, %v1042_v26  ;;  %v3766_v27 = vstv %s2756_s8 }
 0x175   :  { %v1066_v38 = vadd.f32 %v2775_v40, %v1043_v22  ;;  %v1067_v21 = vadd.f32 %v2775_v40, %v1044_v14  ;;  %v1068_v10 = vadd.f32 %v2775_v40, %v1045_v31  ;;  %v1069_v52 = vadd.f32 %v2775_v40, %v1046_v11 }
 0x176   :  { %vm1080_vm10 = vcmp.ge.f32.partialorder %v1064_v2, 0.0  ;;  %vm1081_vm11 = vcmp.ge.f32.partialorder %v1065_v4, 0.0  ;;  %v1097_v5 = vmul.f32 %v3766_v27, %v1064_v2  ;;  %v1098_v34 = vmul.f32 %v3766_v27, %v1065_v4 }
 0x177   :  { %v1099_v35 = vmul.f32 %v3766_v27, %v1066_v38  ;;  %vm1082_vm12 = vcmp.ge.f32.partialorder %v1066_v38, 0.0  ;;  %v1100_v46 = vmul.f32 %v3766_v27, %v1067_v21  ;;  %v3777_v47 = vadd.f32 %v2775_v40, %v3569_v44 }
 0x178   :  { %v3772_v25 = vsel %vm1080_vm10, %v1064_v2, %v1097_v5  ;;  %v3774_v53 = vsel %vm1081_vm11, %v1065_v4, %v1098_v34  ;;  %v3780_v48 = vadd.f32 %v2775_v40, %v3579_v63  ;;  %vm1083_vm13 = vcmp.ge.f32.partialorder %v1067_v21, 0.0 }
 0x179   :  { %v3783_v51 = vadd.f32 %v2775_v40, %v3581_v15  ;;  %v1070_v45 = vadd.f32 %v2775_v40, %v1047_v43  ;;  %v1101_v37 = vmul.f32 %v3766_v27, %v1068_v10  ;;  %v3786_v54 = vsel %vm1082_vm12, %v1066_v38, %v1099_v35 }
 0x17a   :  { %v3789_v19 = vadd.f32 %v2775_v40, %v3591_v24  ;;  %vm1084_vm14 = vcmp.ge.f32.partialorder %v1068_v10, 0.0  ;;  %v1129_v44 = vsel %vm563_vm2, %v3772_v25, 0.0  ;;  %v1130_v63 = vsel %vm563_vm2, %v3774_v53, 0.0 }
 0x17b   :  { %v1071_v7 = vadd.f32 %v2775_v40, %v1048_v36  ;;  %v1102_v8 = vmul.f32 %v3766_v27, %v1069_v52  ;;  %v3796_v15 = vsel %vm1083_vm13, %v1067_v21, %v1100_v46  ;;  %v1131_v9 = vadd.f32 %v1130_v63, %v1129_v44 }
 0x17c   :  { %v1072_v49 = vadd.f32 %v2775_v40, %v1049_v3  ;;  %v1073_v59 = vadd.f32 %v2775_v40, %v1050_v50  ;;  %vm1085_vm15 = vcmp.ge.f32.partialorder %v1069_v52, 0.0  ;;  %v1132_v24 = vsel %vm563_vm2, %v3786_v54, 0.0  ;;  %v1525_v3 = vld [vmem:[%s4865_s11] sm:$0xff] }
 0x17d   :  { %v1074_v61 = vadd.f32 %v2775_v40, %v1051_v60  ;;  %v1103_v41 = vmul.f32 %v3766_v27, %v1070_v45  ;;  %v3801_v16 = vsel %vm1084_vm14, %v1068_v10, %v1101_v37  ;;  %v1133_v6 = vadd.f32 %v1132_v24, %v1131_v9 }
 0x17e   :  { %vm1086_vm1 = vcmp.ge.f32.partialorder %v1070_v45, 0.0  ;;  %v1134_v55 = vsel %vm563_vm2, %v3796_v15, 0.0  ;;  %v1167_v56 = vmul.f32 %v3772_v25, %v3772_v25  ;;  %v1168_v0 = vmul.f32 %v3774_v53, %v3774_v53 }
 0x17f   :  { %v1075_v20 = vadd.f32 %v2775_v40, %v1052_v57  ;;  %v1104_v42 = vmul.f32 %v3766_v27, %v1071_v7  ;;  %v3810_v58 = vsel %vm1085_vm15, %v1069_v52, %v1102_v8  ;;  %v1135_v18 = vadd.f32 %v1134_v55, %v1133_v6  ;;  %v1526_v40 = vld [vmem:[%s4865_s11 + $0x8] sm:$0xff] }
 0x180   :  { %vm1087_vm3 = vcmp.ge.f32.partialorder %v1071_v7, 0.0  ;;  %vm1088_vm4 = vcmp.ge.f32.partialorder %v1072_v49, 0.0  ;;  %v1136_v29 = vsel %vm563_vm2, %v3801_v16, 0.0  ;;  %v1169_v39 = vmul.f32 %v3786_v54, %v3786_v54 }
 0x181   :  { %v1105_v1 = vmul.f32 %v3766_v27, %v1072_v49  ;;  %v3817_v28 = vsel %vm1086_vm1, %v1070_v45, %v1103_v41  ;;  %v1137_v13 = vadd.f32 %v1136_v29, %v1135_v18  ;;  %v1183_v23 = vsel %vm563_vm2, %v1167_v56, 0.0 }
 0x182   :  { %vm1089_vm5 = vcmp.ge.f32.partialorder %v1073_v59, 0.0  ;;  %v1138_v26 = vsel %vm563_vm2, %v3810_v58, 0.0  ;;  %v1170_v22 = vmul.f32 %v3796_v15, %v3796_v15  ;;  %v1184_v14 = vsel %vm563_vm2, %v1168_v0, 0.0 }
 0x183   :  { %v1106_v31 = vmul.f32 %v3766_v27, %v1073_v59  ;;  %v3826_v11 = vsel %vm1087_vm3, %v1071_v7, %v1104_v42  ;;  %v1139_v43 = vadd.f32 %v1138_v26, %v1137_v13  ;;  %v1185_v36 = vadd.f32 %v1184_v14, %v1183_v23 }
 0x184   :  { %vm1090_vm6 = vcmp.ge.f32.partialorder %v1074_v61, 0.0  ;;  %v1140_v50 = vsel %vm563_vm2, %v3817_v28, 0.0  ;;  %v1171_v60 = vmul.f32 %v3801_v16, %v3801_v16  ;;  %v1186_v57 = vsel %vm563_vm2, %v1169_v39, 0.0 }
 0x185   :  { %v1107_v2 = vmul.f32 %v3766_v27, %v1074_v61  ;;  %v3841_v4 = vsel %vm1088_vm4, %v1072_v49, %v1105_v1  ;;  %v1141_v38 = vadd.f32 %v1140_v50, %v1139_v43  ;;  %v1187_v21 = vadd.f32 %v1186_v57, %v1185_v36 }
 0x186   :  { %v1142_v5 = vsel %vm563_vm2, %v3826_v11, 0.0  ;;  %v1172_v34 = vmul.f32 %v3810_v58, %v3810_v58  ;;  %v1188_v10 = vsel %vm563_vm2, %v1170_v22, 0.0  ;;  %v3041_v35 = vpack.c.bf16 %v1526_v40, %v1525_v3 }
 0x187   :  { %v1108_v52 = vmul.f32 %v3766_v27, %v1075_v20  ;;  %v3850_v46 = vsel %vm1089_vm5, %v1073_v59, %v1106_v31  ;;  %v1143_v45 = vadd.f32 %v1142_v5, %v1141_v38  ;;  %v1189_v37 = vadd.f32 %v1188_v10, %v1187_v21 }
 0x188   :  { %vm1091_vm7 = vcmp.ge.f32.partialorder %v1075_v20, 0.0  ;;  %v1144_v44 = vsel %vm563_vm2, %v3841_v4, 0.0  ;;  %v1173_v63 = vmul.f32 %v3817_v28, %v3817_v28  ;;  %v1190_v7 = vsel %vm563_vm2, %v1171_v60, 0.0  ;;  %3042 = vmatprep.subr.bf16.mxu0 %v3041_v35 }
 0x189   :  { %v1109_v8 = vmul.f32 %v3766_v27, %v3777_v47  ;;  %v3860_v9 = vsel %vm1090_vm6, %v1074_v61, %v1107_v2  ;;  %v1145_v49 = vadd.f32 %v1144_v44, %v1143_v45  ;;  %v1191_v59 = vadd.f32 %v1190_v7, %v1189_v37  ;;  %3044 = vmatpush3.bf16.msra.mxu0 %v3041_v35 }
 0x18a   :  { %vm1092_vm8 = vcmp.ge.f32.partialorder %v3777_v47, 0.0  ;;  %v1146_v24 = vsel %vm563_vm2, %v3850_v46, 0.0  ;;  %v1174_v41 = vmul.f32 %v3826_v11, %v3826_v11  ;;  %v1192_v6 = vsel %vm563_vm2, %v1172_v34, 0.0 }
 0x18b   :  { %v1110_v55 = vmul.f32 %v3766_v27, %v3780_v48  ;;  %v3870_v56 = vsel %vm1091_vm7, %v1075_v20, %v1108_v52  ;;  %v1147_v61 = vadd.f32 %v1146_v24, %v1145_v49  ;;  %v1193_v0 = vadd.f32 %v1192_v6, %v1191_v59 }
 0x18c   :  { %vm1093_vm9 = vcmp.ge.f32.partialorder %v3780_v48, 0.0  ;;  %v1148_v42 = vsel %vm563_vm2, %v3860_v9, 0.0  ;;  %v1175_v18 = vmul.f32 %v3841_v4, %v3841_v4  ;;  %v1194_v29 = vsel %vm563_vm2, %v1173_v63, 0.0 }
 0x18d   :  { %v1111_v39 = vmul.f32 %v3766_v27, %v3783_v51  ;;  %v3881_v1 = vsel %vm1092_vm8, %v3777_v47, %v1109_v8  ;;  %v1149_v20 = vadd.f32 %v1148_v42, %v1147_v61  ;;  %v1195_v13 = vadd.f32 %v1194_v29, %v1193_v0 }
 0x18e   :  { %vm1094_vm10 = vcmp.ge.f32.partialorder %v3783_v51, 0.0  ;;  %v1150_v23 = vsel %vm563_vm2, %v3870_v56, 0.0  ;;  %v1176_v26 = vmul.f32 %v3850_v46, %v3850_v46  ;;  %v1196_v22 = vsel %vm563_vm2, %v1174_v41, 0.0 }
 0x18f   :  { %v1112_v14 = vmul.f32 %v3766_v27, %v3789_v19  ;;  %v3892_v31 = vsel %vm1093_vm9, %v3780_v48, %v1110_v55  ;;  %v1151_v47 = vadd.f32 %v1150_v23, %v1149_v20  ;;  %v1197_v43 = vadd.f32 %v1196_v22, %v1195_v13 }
 0x190   :  { %vm1095_vm11 = vcmp.ge.f32.partialorder %v3789_v19, 0.0  ;;  %v1152_v36 = vsel %vm563_vm2, %v3881_v1, 0.0  ;;  %v1177_v3 = vmul.f32 %v3860_v9, %v3860_v9  ;;  %v1198_v40 = vsel %vm563_vm2, %v1175_v18, 0.0 }
 0x191   :  { %v3901_v50 = vsel %vm1094_vm10, %v3783_v51, %v1111_v39  ;;  %v1153_v60 = vadd.f32 %v1152_v36, %v1151_v47  ;;  %v1199_v27 = vadd.f32 %v1198_v40, %v1197_v43  ;;  %v1154_v48 = vsel %vm563_vm2, %v3892_v31, 0.0 }
 0x192   :  { %v1178_v57 = vmul.f32 %v3870_v56, %v3870_v56  ;;  %v1200_v2 = vsel %vm563_vm2, %v1176_v26, 0.0  ;;  %v3909_v38 = vsel %vm1095_vm11, %v3789_v19, %v1112_v14  ;;  %v1156_v34 = vsel %vm563_vm2, %v3901_v50, 0.0 }
 0x193   :  { %v1155_v21 = vadd.f32 %v1154_v48, %v1153_v60  ;;  %v1201_v5 = vadd.f32 %v1200_v2, %v1199_v27  ;;  %v1179_v51 = vmul.f32 %v3881_v1, %v3881_v1  ;;  %v1202_v10 = vsel %vm563_vm2, %v1177_v3, 0.0 }
 0x194   :  { %v1158_v45 = vsel %vm563_vm2, %v3909_v38, 0.0  ;;  %v1180_v37 = vmul.f32 %v3892_v31, %v3892_v31  ;;  %v1204_v19 = vsel %vm563_vm2, %v1178_v57, 0.0  ;;  %v1181_v7 = vmul.f32 %v3901_v50, %v3901_v50 }
 0x195   :  { %v1157_v35 = vadd.f32 %v1156_v34, %v1155_v21  ;;  %v1203_v52 = vadd.f32 %v1202_v10, %v1201_v5  ;;  %v1206_v8 = vsel %vm563_vm2, %v1179_v51, 0.0  ;;  %v1182_v24 = vmul.f32 %v3909_v38, %v3909_v38 }
 0x196   :  { %v1208_v41 = vsel %vm563_vm2, %v1180_v37, 0.0  ;;  %v1210_v61 = vsel %vm563_vm2, %v1181_v7, 0.0 }
 0x197   :  { %v1159_v44 = vadd.f32 %v1158_v45, %v1157_v35  ;;  %v1205_v63 = vadd.f32 %v1204_v19, %v1203_v52  ;;  %v1212_v18 = vsel %vm563_vm2, %v1182_v24, 0.0 }
 0x199   :  { %v1160_v49 = vrot.slane %v1159_v44, 4  ;;  %v1207_v59 = vadd.f32 %v1206_v8, %v1205_v63 }
 0x19b   :  { %v1161_v6 = vadd.f32 %v1160_v49, %v1159_v44  ;;  %v1209_v55 = vadd.f32 %v1208_v41, %v1207_v59 }
 0x19d   :  { %v1162_v0 = vrot.slane %v1161_v6, 2  ;;  %v1211_v42 = vadd.f32 %v1210_v61, %v1209_v55 }
 0x19f   :  { %v1163_v29 = vadd.f32 %v1162_v0, %v1161_v6  ;;  %v1213_v39 = vadd.f32 %v1212_v18, %v1211_v42 }
 0x1a1   :  { %v1164_v20 = vrot.slane %v1163_v29, 1  ;;  %v1214_v13 = vrot.slane %v1213_v39, 4 }
 0x1a3   :  { %v1165_v23 = vadd.f32 %v1164_v20, %v1163_v29  ;;  %v1215_v26 = vadd.f32 %v1214_v13, %v1213_v39 }
 0x1a5   :  { %v1166_v22 = vmul.f32 0.0078125, %v1165_v23  ;;  %v1216_v14 = vrot.slane %v1215_v26, 2 }
 0x1a7   :  { %v1217_v47 = vadd.f32 %v1216_v14, %v1215_v26  ;;  %v1224_v43 = vsub.f32 %v3772_v25, %v1166_v22  ;;  %v1225_v36 = vsub.f32 %v3774_v53, %v1166_v22  ;;  %v1226_v3 = vsub.f32 %v3786_v54, %v1166_v22 }
 0x1a8   :  { %v1227_v40 = vsub.f32 %v3796_v15, %v1166_v22  ;;  %v1228_v60 = vsub.f32 %v3801_v16, %v1166_v22  ;;  %v1229_v27 = vsub.f32 %v3810_v58, %v1166_v22  ;;  %v1230_v57 = vsub.f32 %v3817_v28, %v1166_v22  ;;  %v1242_v28 = vld [vmem:[%s4863_s9] sm:$0x1] }
 0x1a9   :  { %v1218_v48 = vrot.slane %v1217_v47, 1  ;;  %v1231_v2 = vsub.f32 %v3826_v11, %v1166_v22  ;;  %v1232_v21 = vsub.f32 %v3841_v4, %v1166_v22  ;;  %v1233_v5 = vsub.f32 %v3850_v46, %v1166_v22 }
 0x1aa   :  { %v1234_v25 = vsub.f32 %v3860_v9, %v1166_v22  ;;  %v1235_v53 = vsub.f32 %v3870_v56, %v1166_v22  ;;  %v1236_v54 = vsub.f32 %v3881_v1, %v1166_v22  ;;  %v1221_v34 = vmul.f32 %v1166_v22, %v1166_v22  ;;  %v2776_v9 = vld [vmem:[%s4864_s10] ss:$0 sm:$0xff] }
 0x1ab   :  { %v1219_v15 = vadd.f32 %v1218_v48, %v1217_v47  ;;  %v1237_v49 = vsub.f32 %v3892_v31, %v1166_v22  ;;  %v1238_v59 = vsub.f32 %v3901_v50, %v1166_v22  ;;  %v1239_v24 = vsub.f32 %v3909_v38, %v1166_v22 }
 0x1ad   :  { %v1220_v16 = vmul.f32 0.0078125, %v1219_v15 }
 0x1af   :  { %v1222_v51 = vsub.f32 %v1220_v16, %v1221_v34  ;;  %v3065_v34 = vld [vmem:[%s4903_s25 + $0x10] sm:$0xff] }
 0x1b1   :  { %v1223_v58 = vmax.f32 %v1222_v51, 0.0 }
 0x1b3   :  { %v1240_v10 = vadd.f32 1e-05, %v1223_v58 }
 0x1b5   :  { %3056 = vrsqrt.f32 %v1240_v10 }
 0x1bf   :  { %v3057_v11 = vpop.eup %3056 }
 0x1c0   :  { %v1243_v4 = vmul.f32 %v3057_v11, %v1242_v28  ;;  %v3066_v28 = vld [vmem:[%s4903_s25 + $0x28] sm:$0xff] }
 0x1c2   :  { %v1247_v46 = vrot.slane %v1243_v4, %v3489_v32 }
 0x1c4   :  { %v1248_v56 = vmul.f32 %v1247_v46, %v1224_v43  ;;  %v1249_v1 = vmul.f32 %v1247_v46, %v1225_v36  ;;  %v1250_v35 = vmul.f32 %v1247_v46, %v1226_v3  ;;  %v1251_v52 = vmul.f32 %v1247_v46, %v1227_v40  ;;  %v3062_v40 = vld [vmem:[%s4903_s25 + $0x8] sm:$0xff] }
 0x1c5   :  { %v1252_v45 = vmul.f32 %v1247_v46, %v1228_v60  ;;  %v1253_v37 = vmul.f32 %v1247_v46, %v1229_v27  ;;  %v1254_v19 = vmul.f32 %v1247_v46, %v1230_v57  ;;  %v1255_v44 = vmul.f32 %v1247_v46, %v1231_v2  ;;  %v3974_v27 = vld [vmem:[%s4916_s2] ss:$0 sm:$0xff] }
 0x1c6   :  { %v1271_v63 = vadd.f32 %v2776_v9, %v1248_v56  ;;  %v1272_v7 = vadd.f32 %v2776_v9, %v1249_v1  ;;  %v1273_v8 = vadd.f32 %v2776_v9, %v1250_v35  ;;  %v1256_v41 = vmul.f32 %v1247_v46, %v1232_v21  ;;  %v3063_v57 = vld [vmem:[%s4903_s25] sm:$0xff] }
 0x1c7   :  { %v1257_v6 = vmul.f32 %v1247_v46, %v1233_v5  ;;  %v1258_v55 = vmul.f32 %v1247_v46, %v1234_v25  ;;  %v1259_v61 = vmul.f32 %v1247_v46, %v1235_v53  ;;  %v1260_v0 = vmul.f32 %v1247_v46, %v1236_v54  ;;  %v3064_v53 = vld [vmem:[%s4903_s25 + $0x18] sm:$0xff] }
 0x1c8   :  { %2945 = vmatprep.mubr.msk.f32.mxu1 %vm563_vm2, %v1271_v63  ;;  %v1261_v42 = vmul.f32 %v1247_v46, %v1237_v49  ;;  %v1262_v18 = vmul.f32 %v1247_v46, %v1238_v59  ;;  %v1263_v29 = vmul.f32 %v1247_v46, %v1239_v24  ;;  %v1274_v39 = vadd.f32 %v2776_v9, %v1251_v52  ;;  %v3067_v46 = vld [vmem:[%s4903_s25 + $0x20] sm:$0xff]  ;;  %v3068_v52 = vld [vmem:[%s4903_s25 + $0x38] sm:$0xff]  ;;  %v3070_v49 = vld [vmem:[%s4903_s25 + $0x48] sm:$0xff] }
 0x1c9   :  { %2946 = vmatmul.mubr.msk.f32.vlgmr.msra.gmra.mrb[0].mxu1 %vm563_vm2, %v1272_v7  ;;  %v1275_v31 = vadd.f32 %v2776_v9, %v1252_v45  ;;  %v1276_v50 = vadd.f32 %v2776_v9, %v1253_v37  ;;  %v1277_v38 = vadd.f32 %v2776_v9, %v1254_v19  ;;  %v1278_v20 = vadd.f32 %v2776_v9, %v1255_v44  ;;  %v3069_v19 = vld [vmem:[%s4903_s25 + $0x30] sm:$0xff] }
 0x1ca   :  { %2948 = vmatprep.mubr.msk.f32.mxu1 %vm563_vm2, %v1273_v8  ;;  %v1279_v13 = vadd.f32 %v2776_v9, %v1256_v41  ;;  %v1280_v23 = vadd.f32 %v2776_v9, %v1257_v6  ;;  %v1281_v26 = vadd.f32 %v2776_v9, %v1258_v55  ;;  %v1282_v22 = vadd.f32 %v2776_v9, %v1259_v61  ;;  %v3071_v41 = vld [vmem:[%s4903_s25 + $0x40] sm:$0xff] }
 0x1cb   :  { %v1283_v14 = vadd.f32 %v2776_v9, %v1260_v0  ;;  %v1284_v47 = vadd.f32 %v2776_v9, %v1261_v42  ;;  %v1285_v43 = vadd.f32 %v2776_v9, %v1262_v18  ;;  %v1286_v36 = vadd.f32 %v2776_v9, %v1263_v29  ;;  %v3072_v42 = vld [vmem:[%s4903_s25 + $0x58] sm:$0xff] }
 0x1cd   :  { %2949 = vmatmul.mubr.msk.f32.gmra.mrb[2].mxu1 %vm563_vm2, %v1274_v39  ;;  %v3073_v39 = vld [vmem:[%s4903_s25 + $0x50] sm:$0xff] }
 0x1ce   :  { %2951 = vmatprep.mubr.msk.f32.mxu1 %vm563_vm2, %v1275_v31 }
 0x1d1   :  { %2952 = vmatmul.mubr.msk.f32.gmra.mrb[4].mxu1 %vm563_vm2, %v1276_v50 }
 0x1d2   :  { %2954 = vmatprep.mubr.msk.f32.mxu1 %vm563_vm2, %v1277_v38 }
 0x1d5   :  { %2955 = vmatmul.mubr.msk.f32.gmra.mrb[6].mxu1 %vm563_vm2, %v1278_v20 }
 0x1d6   :  { %2957 = vmatprep.mubr.msk.f32.mxu1 %vm563_vm2, %v1279_v13  ;;  %v3074_v13 = vld [vmem:[%s4903_s25 + $0x68] sm:$0xff] }
 0x1d9   :  { %2958 = vmatmul.mubr.msk.f32.gmra.mrb[8].mxu1 %vm563_vm2, %v1280_v23 }
 0x1da   :  { %2960 = vmatprep.mubr.msk.f32.mxu1 %vm563_vm2, %v1281_v26 }
 0x1dd   :  { %2961 = vmatmul.mubr.msk.f32.gmra.mrb[10].mxu1 %vm563_vm2, %v1282_v22  ;;  %v3075_v22 = vld [vmem:[%s4903_s25 + $0x60] sm:$0xff] }
 0x1de   :  { %2963 = vmatprep.mubr.msk.f32.mxu1 %vm563_vm2, %v1283_v14 }
 0x1e1   :  { %2964 = vmatmul.mubr.msk.f32.gmra.mrb[12].mxu1 %vm563_vm2, %v1284_v47 }
 0x1e2   :  { %2966 = vmatprep.mubr.msk.f32.mxu1 %vm563_vm2, %v1285_v43 }
 0x1e5   :  { %2967 = vmatmul.mubr.msk.f32.gmra.mrb[14].mxu1 %vm563_vm2, %v1286_v36 }
 0x29c   :  { %v2947_v3 = vpop.f32.mrb[0].mxu1 }
 0x29d   :  { %v1485_v60 = vadd.f32 %v3062_v40, %v2947_v3  ;;  %v1405_v48 = vpop.f32.mrb[1].mxu1  ;;  %v3076_v3 = vld [vmem:[%s4903_s25 + $0x78] sm:$0xff] }
 0x29e   :  { %v1484_v2 = vadd.f32 %v3063_v57, %v1405_v48  ;;  %v3077_v48 = vld [vmem:[%s4903_s25 + $0x70] sm:$0xff] }
 0x29f   :  { %v3983_v25 = vadd.f32 %v3974_v27, %v1485_v60 }
 0x2a0   :  { %v3980_v21 = vadd.f32 %v3974_v27, %v1484_v2  ;;  %v2950_v5 = vpop.f32.mrb[2].mxu1 }
 0x2a1   :  { %v1487_v54 = vadd.f32 %v3064_v53, %v2950_v5  ;;  %v1415_v15 = vpop.f32.mrb[3].mxu1  ;;  %v2499_v53 = vld [vmem:[%s4869_s15] sm:$0xff] }
 0x2a2   :  { %v1486_v16 = vadd.f32 %v3065_v34, %v1415_v15  ;;  %2973 = vmatprep.mubr.msk.f32.mxu0 %vm320_vm0, %v3980_v21  ;;  %v2501_v15 = vld [vmem:[%s4869_s15 + $0x10] sm:$0xff]  ;;  %v2502_v34 = vld [vmem:[%s4869_s15 + $0x18] sm:$0xff] }
 0x2a3   :  { %2974 = vmatmul.mubr.msk.f32.vlgmr.msra.gmra.mrb[16].mxu0 %vm320_vm0, %v3983_v25  ;;  %v3999_v10 = vadd.f32 %v3974_v27, %v1487_v54  ;;  %v2500_v54 = vld [vmem:[%s4869_s15 + $0x8] sm:$0xff] }
 0x2a4   :  { %v3996_v51 = vadd.f32 %v3974_v27, %v1486_v16  ;;  %v2953_v58 = vpop.f32.mrb[4].mxu1  ;;  %v3049_v16 = vpack.c.bf16 %v2502_v34, %v2501_v15 }
 0x2a5   :  { %v1489_v11 = vadd.f32 %v3066_v28, %v2953_v58  ;;  %v1425_v4 = vpop.f32.mrb[5].mxu1  ;;  %v4116_v58 = vld [vmem:[%s4866_s12] ss:$0 sm:$0xff] }
 0x2a6   :  { %v1488_v9 = vadd.f32 %v3067_v46, %v1425_v4  ;;  %2976 = vmatprep.mubr.msk.f32.mxu0 %vm320_vm0, %v3996_v51 }
 0x2a7   :  { %2977 = vmatmul.mubr.msk.f32.gmra.mrb[18].mxu0 %vm320_vm0, %v3999_v10  ;;  %v4015_v35 = vadd.f32 %v3974_v27, %v1489_v11  ;;  %v4118_v11 = vstv %s2794_s6 }
 0x2a8   :  { %v4012_v56 = vadd.f32 %v3974_v27, %v1488_v9  ;;  %v2956_v1 = vpop.f32.mrb[6].mxu1 }
 0x2a9   :  { %v1491_v45 = vadd.f32 %v3068_v52, %v2956_v1  ;;  %v1435_v37 = vpop.f32.mrb[7].mxu1 }
 0x2aa   :  { %v1490_v44 = vadd.f32 %v3069_v19, %v1435_v37  ;;  %2979 = vmatprep.mubr.msk.f32.mxu0 %vm320_vm0, %v4012_v56 }
 0x2ab   :  { %2980 = vmatmul.mubr.msk.f32.gmra.mrb[20].mxu0 %vm320_vm0, %v4015_v35  ;;  %v4031_v8 = vadd.f32 %v3974_v27, %v1491_v45 }
 0x2ac   :  { %v4028_v63 = vadd.f32 %v3974_v27, %v1490_v44  ;;  %v2959_v7 = vpop.f32.mrb[8].mxu1 }
 0x2ad   :  { %v1493_v59 = vadd.f32 %v3070_v49, %v2959_v7  ;;  %v1445_v24 = vpop.f32.mrb[9].mxu1 }
 0x2ae   :  { %v1492_v6 = vadd.f32 %v3071_v41, %v1445_v24  ;;  %2982 = vmatprep.mubr.msk.f32.mxu0 %vm320_vm0, %v4028_v63 }
 0x2af   :  { %2983 = vmatmul.mubr.msk.f32.gmra.mrb[22].mxu0 %vm320_vm0, %v4031_v8  ;;  %v4047_v0 = vadd.f32 %v3974_v27, %v1493_v59 }
 0x2b0   :  { %v4044_v55 = vadd.f32 %v3974_v27, %v1492_v6  ;;  %v2962_v61 = vpop.f32.mrb[10].mxu1 }
 0x2b1   :  { %4918 = vst [vmem:[#allocation6_spill] sm:$0xff] %v4047_v0  ;;  %v1495_v18 = vadd.f32 %v3072_v42, %v2962_v61  ;;  %v1455_v29 = vpop.f32.mrb[11].mxu1 }
 0x2b2   :  { %4917 = vst [vmem:[#allocation5_spill] sm:$0xff] %v4044_v55  ;;  %v1494_v31 = vadd.f32 %v3073_v39, %v1455_v29  ;;  %2985 = vmatprep.mubr.msk.f32.mxu0 %vm320_vm0, %v4044_v55 }
 0x2b3   :  { %2986 = vmatmul.mubr.msk.f32.gmra.mrb[24].mxu0 %vm320_vm0, %v4047_v0  ;;  %v4063_v20 = vadd.f32 %v3974_v27, %v1495_v18 }
 0x2b4   :  { %v4060_v50 = vadd.f32 %v3974_v27, %v1494_v31  ;;  %v2965_v38 = vpop.f32.mrb[12].mxu1 }
 0x2b5   :  { %4920 = vst [vmem:[#allocation8_spill] sm:$0xff] %v4063_v20  ;;  %v1497_v23 = vadd.f32 %v3074_v13, %v2965_v38  ;;  %v1465_v26 = vpop.f32.mrb[13].mxu1 }
 0x2b6   :  { %4919 = vst [vmem:[#allocation7_spill] sm:$0xff] %v4060_v50  ;;  %v1496_v14 = vadd.f32 %v3075_v22, %v1465_v26  ;;  %2988 = vmatprep.mubr.msk.f32.mxu0 %vm320_vm0, %v4060_v50 }
 0x2b7   :  { %2989 = vmatmul.mubr.msk.f32.gmra.mrb[26].mxu0 %vm320_vm0, %v4063_v20  ;;  %v4079_v36 = vadd.f32 %v3974_v27, %v1497_v23 }
 0x2b8   :  { %v4076_v47 = vadd.f32 %v3974_v27, %v1496_v14  ;;  %v2968_v43 = vpop.f32.mrb[14].mxu1 }
 0x2b9   :  { %4922 = vst [vmem:[#allocation10_spill] sm:$0xff] %v4079_v36  ;;  %v1499_v40 = vadd.f32 %v3076_v3, %v2968_v43  ;;  %v1475_v60 = vpop.f32.mrb[15].mxu1 }
 0x2ba   :  { %4921 = vst [vmem:[#allocation9_spill] sm:$0xff] %v4076_v47  ;;  %v1498_v57 = vadd.f32 %v3077_v48, %v1475_v60  ;;  %2991 = vmatprep.mubr.msk.f32.mxu0 %vm320_vm0, %v4076_v47 }
 0x2bb   :  { %2992 = vmatmul.mubr.msk.f32.gmra.mrb[28].mxu0 %vm320_vm0, %v4079_v36  ;;  %v4095_v5 = vadd.f32 %v3974_v27, %v1499_v40 }
 0x2bc   :  { %v4092_v2 = vadd.f32 %v3974_v27, %v1498_v57  ;;  %v3045_v27 = vpack.c.bf16 %v2500_v54, %v2499_v53 }
 0x2bd   :  { %4924 = vst [vmem:[#allocation12_spill] sm:$0xff] %v4095_v5 }
 0x2be   :  { %4923 = vst [vmem:[#allocation11_spill] sm:$0xff] %v4092_v2  ;;  %2994 = vmatprep.mubr.msk.f32.mxu0 %vm320_vm0, %v4092_v2  ;;  %3046 = vmatprep.subr.bf16.mxu1 %v3045_v27 }
 0x2bf   :  { %2995 = vmatmul.mubr.msk.f32.gmra.mrb[30].mxu0 %vm320_vm0, %v4095_v5  ;;  %3048 = vmatpush3.bf16.msra.mxu1 %v3045_v27 }
 0x2c0   :  { %3050 = vmatprep.subr.bf16.mxu1 %v3049_v16 }
 0x2c3   :  { %3052 = vmatpush3.bf16.msra.mxu1 %v3049_v16 }
 0x376   :  { %v2975_v28 = vpop.f32.mrb[16].mxu0 }
 0x377   :  { %v1654_v4 = vadd.f32 %v2975_v28, %v4116_v58  ;;  %v1648_v46 = vpop.f32.mrb[17].mxu0 }
 0x378   :  { %v1649_v9 = vadd.f32 %v4116_v58, %v1648_v46 }
 0x379   :  { %vm1728_vm12 = vcmp.ge.f32.partialorder %v1654_v4, 0.0  ;;  %v1745_v1 = vmul.f32 %v4118_v11, %v1654_v4 }
 0x37a   :  { %vm1727_vm13 = vcmp.ge.f32.partialorder %v1649_v9, 0.0  ;;  %v1744_v52 = vmul.f32 %v4118_v11, %v1649_v9  ;;  %v2978_v45 = vpop.f32.mrb[18].mxu0 }
 0x37b   :  { %v4124_v37 = vsel %vm1728_vm12, %v1654_v4, %v1745_v1  ;;  %v1664_v19 = vadd.f32 %v2978_v45, %v4116_v58  ;;  %v1658_v44 = vpop.f32.mrb[19].mxu0 }
 0x37c   :  { %v1777_v7 = vsel %vm563_vm2, %v4124_v37, 0.0  ;;  %v1815_v49 = vmul.f32 %v4124_v37, %v4124_v37  ;;  %v4131_v59 = vsel %vm1727_vm13, %v1649_v9, %v1744_v52  ;;  %v1659_v24 = vadd.f32 %v4116_v58, %v1658_v44 }
 0x37d   :  { %v1776_v41 = vsel %vm563_vm2, %v4131_v59, 0.0  ;;  %v1814_v6 = vmul.f32 %v4131_v59, %v4131_v59  ;;  %vm1730_vm14 = vcmp.ge.f32.partialorder %v1664_v19, 0.0  ;;  %v1747_v61 = vmul.f32 %v4118_v11, %v1664_v19 }
 0x37e   :  { %v1831_v42 = vsel %vm563_vm2, %v1815_v49, 0.0  ;;  %v1778_v18 = vadd.f32 %v1777_v7, %v1776_v41  ;;  %vm1729_vm15 = vcmp.ge.f32.partialorder %v1659_v24, 0.0  ;;  %v1746_v29 = vmul.f32 %v4118_v11, %v1659_v24  ;;  %v2981_v39 = vpop.f32.mrb[20].mxu0 }
 0x37f   :  { %v1830_v31 = vsel %vm563_vm2, %v1814_v6, 0.0  ;;  %v4142_v38 = vsel %vm1730_vm14, %v1664_v19, %v1747_v61  ;;  %v1674_v13 = vadd.f32 %v2981_v39, %v4116_v58  ;;  %v1668_v23 = vpop.f32.mrb[21].mxu0  ;;  %vm1951_vm14 = vcmask 1041408  }
 0x380   :  { %v1832_v26 = vadd.f32 %v1831_v42, %v1830_v31  ;;  %v1817_v22 = vmul.f32 %v4142_v38, %v4142_v38  ;;  %v4147_v14 = vsel %vm1729_vm15, %v1659_v24, %v1746_v29  ;;  %v1669_v48 = vadd.f32 %v4116_v58, %v1668_v23 }
 0x381   :  { %v1779_v43 = vsel %vm563_vm2, %v4147_v14, 0.0  ;;  %v1816_v3 = vmul.f32 %v4147_v14, %v4147_v14  ;;  %vm1732_vm1 = vcmp.ge.f32.partialorder %v1674_v13, 0.0  ;;  %v1749_v40 = vmul.f32 %v4118_v11, %v1674_v13 }
 0x382   :  { %v1780_v60 = vadd.f32 %v1779_v43, %v1778_v18  ;;  %v2984_v57 = vpop.f32.mrb[22].mxu0  ;;  %v1781_v34 = vsel %vm563_vm2, %v4142_v38, 0.0  ;;  %v1835_v16 = vsel %vm563_vm2, %v1817_v22, 0.0  ;;  %vm1731_vm3 = vcmp.ge.f32.partialorder %v1669_v48, 0.0 }
 0x383   :  { %v1833_v53 = vsel %vm563_vm2, %v1816_v3, 0.0  ;;  %v4156_v54 = vsel %vm1732_vm1, %v1674_v13, %v1749_v40  ;;  %v1684_v15 = vadd.f32 %v2984_v57, %v4116_v58  ;;  %v1678_v27 = vpop.f32.mrb[23].mxu0  ;;  %v1748_v4 = vmul.f32 %v4118_v11, %v1669_v48 }
 0x384   :  { %v1834_v28 = vadd.f32 %v1833_v53, %v1832_v26  ;;  %v1782_v46 = vadd.f32 %v1781_v34, %v1780_v60  ;;  %v1819_v1 = vmul.f32 %v4156_v54, %v4156_v54  ;;  %v1679_v45 = vadd.f32 %v4116_v58, %v1678_v27 }
 0x385   :  { %vm1734_vm4 = vcmp.ge.f32.partialorder %v1684_v15, 0.0  ;;  %v1751_v9 = vmul.f32 %v4118_v11, %v1684_v15  ;;  %v4167_v44 = vsel %vm1731_vm3, %v1669_v48, %v1748_v4  ;;  %v1785_v41 = vsel %vm563_vm2, %v4156_v54, 0.0 }
 0x386   :  { %v1836_v52 = vadd.f32 %v1835_v16, %v1834_v28  ;;  %v2987_v19 = vpop.f32.mrb[24].mxu0  ;;  %v1783_v6 = vsel %vm563_vm2, %v4167_v44, 0.0  ;;  %v1818_v61 = vmul.f32 %v4167_v44, %v4167_v44  ;;  %vm1733_vm5 = vcmp.ge.f32.partialorder %v1679_v45, 0.0 }
 0x387   :  { %v4169_v7 = vsel %vm1734_vm4, %v1684_v15, %v1751_v9  ;;  %v1694_v49 = vadd.f32 %v2987_v19, %v4116_v58  ;;  %v1688_v24 = vpop.f32.mrb[25].mxu0  ;;  %v1784_v18 = vadd.f32 %v1783_v6, %v1782_v46  ;;  %v1750_v29 = vmul.f32 %v4118_v11, %v1679_v45 }
 0x388   :  { %v1821_v42 = vmul.f32 %v4169_v7, %v4169_v7  ;;  %v1839_v39 = vsel %vm563_vm2, %v1819_v1, 0.0  ;;  %v1837_v31 = vsel %vm563_vm2, %v1818_v61, 0.0  ;;  %v1689_v23 = vadd.f32 %v4116_v58, %v1688_v24 }
 0x389   :  { %vm1736_vm6 = vcmp.ge.f32.partialorder %v1694_v49, 0.0  ;;  %v1753_v13 = vmul.f32 %v4118_v11, %v1694_v49  ;;  %v1838_v22 = vadd.f32 %v1837_v31, %v1836_v52  ;;  %v4185_v43 = vsel %vm1733_vm5, %v1679_v45, %v1750_v29 }
 0x38a   :  { %v2990_v26 = vpop.f32.mrb[26].mxu0  ;;  %v1786_v3 = vadd.f32 %v1785_v41, %v1784_v18  ;;  %v1789_v48 = vsel %vm563_vm2, %v4169_v7, 0.0  ;;  %v1787_v57 = vsel %vm563_vm2, %v4185_v43, 0.0  ;;  %v1820_v53 = vmul.f32 %v4185_v43, %v4185_v43 }
 0x38b   :  { %v1704_v40 = vadd.f32 %v2990_v26, %v4116_v58  ;;  %v1698_v60 = vpop.f32.mrb[27].mxu0  ;;  %v4194_v15 = vsel %vm1736_vm6, %v1694_v49, %v1753_v13  ;;  %v1843_v27 = vsel %vm563_vm2, %v1821_v42, 0.0  ;;  %v1840_v16 = vadd.f32 %v1839_v39, %v1838_v22 }
 0x38c   :  { %v1788_v34 = vadd.f32 %v1787_v57, %v1786_v3  ;;  %vm1735_vm7 = vcmp.ge.f32.partialorder %v1689_v23, 0.0  ;;  %v1841_v28 = vsel %vm563_vm2, %v1820_v53, 0.0  ;;  %v1752_v4 = vmul.f32 %v4118_v11, %v1689_v23 }
 0x38d   :  { %vm1738_vm8 = vcmp.ge.f32.partialorder %v1704_v40, 0.0  ;;  %v1755_v46 = vmul.f32 %v4118_v11, %v1704_v40  ;;  %v1842_v1 = vadd.f32 %v1841_v28, %v1840_v16  ;;  %v1823_v52 = vmul.f32 %v4194_v15, %v4194_v15 }
 0x38e   :  { %v2993_v9 = vpop.f32.mrb[28].mxu0  ;;  %v1790_v45 = vadd.f32 %v1789_v48, %v1788_v34  ;;  %v1699_v19 = vadd.f32 %v4116_v58, %v1698_v60  ;;  %v4203_v24 = vsel %vm1735_vm7, %v1689_v23, %v1752_v4  ;;  %v1793_v42 = vsel %vm563_vm2, %v4194_v15, 0.0 }
 0x38f   :  { %v1708_v49 = vpop.f32.mrb[29].mxu0  ;;  %v4205_v41 = vsel %vm1738_vm8, %v1704_v40, %v1755_v46  ;;  %v1714_v6 = vadd.f32 %v2993_v9, %v4116_v58  ;;  %v1791_v18 = vsel %vm563_vm2, %v4203_v24, 0.0  ;;  %v1822_v29 = vmul.f32 %v4203_v24, %v4203_v24 }
 0x390   :  { %v1709_v61 = vadd.f32 %v4116_v58, %v1708_v49  ;;  %v1844_v39 = vadd.f32 %v1843_v27, %v1842_v1  ;;  %v1792_v31 = vadd.f32 %v1791_v18, %v1790_v45  ;;  %v1825_v13 = vmul.f32 %v4205_v41, %v4205_v41 }
 0x391   :  { %vm1737_vm9 = vcmp.ge.f32.partialorder %v1699_v19, 0.0  ;;  %v1754_v23 = vmul.f32 %v4118_v11, %v1699_v19  ;;  %v1847_v22 = vsel %vm563_vm2, %v1823_v52, 0.0  ;;  %v1845_v3 = vsel %vm563_vm2, %v1822_v29, 0.0 }
 0x392   :  { %v2996_v26 = vpop.f32.mrb[30].mxu0  ;;  %vm1740_vm10 = vcmp.ge.f32.partialorder %v1714_v6, 0.0  ;;  %v1757_v40 = vmul.f32 %v4118_v11, %v1714_v6  ;;  %v1846_v48 = vadd.f32 %v1845_v3, %v1844_v39  ;;  %v1794_v53 = vadd.f32 %v1793_v42, %v1792_v31 }
 0x393   :  { %v1718_v60 = vpop.f32.mrb[31].mxu0  ;;  %v4221_v57 = vsel %vm1737_vm9, %v1699_v19, %v1754_v23  ;;  %vm1739_vm11 = vcmp.ge.f32.partialorder %v1709_v61, 0.0  ;;  %v1756_v28 = vmul.f32 %v4118_v11, %v1709_v61  ;;  %v1797_v4 = vsel %vm563_vm2, %v4205_v41, 0.0 }
 0x394   :  { %v1795_v27 = vsel %vm563_vm2, %v4221_v57, 0.0  ;;  %v1824_v34 = vmul.f32 %v4221_v57, %v4221_v57  ;;  %v4227_v16 = vsel %vm1740_vm10, %v1714_v6, %v1757_v40  ;;  %v1851_v46 = vsel %vm563_vm2, %v1825_v13, 0.0 }
 0x395   :  { %v1796_v9 = vadd.f32 %v1795_v27, %v1794_v53  ;;  %v1848_v1 = vadd.f32 %v1847_v22, %v1846_v48  ;;  %v4234_v45 = vsel %vm1739_vm11, %v1709_v61, %v1756_v28  ;;  %v1724_v19 = vadd.f32 %v2996_v26, %v4116_v58 }
 0x396   :  { %v1849_v52 = vsel %vm563_vm2, %v1824_v34, 0.0  ;;  %v1719_v49 = vadd.f32 %v4116_v58, %v1718_v60  ;;  %v1827_v6 = vmul.f32 %v4227_v16, %v4227_v16  ;;  %v1799_v29 = vsel %vm563_vm2, %v4234_v45, 0.0 }
 0x397   :  { %v1850_v42 = vadd.f32 %v1849_v52, %v1848_v1  ;;  %v1798_v18 = vadd.f32 %v1797_v4, %v1796_v9  ;;  %v1826_v39 = vmul.f32 %v4234_v45, %v4234_v45  ;;  %vm1742_vm12 = vcmp.ge.f32.partialorder %v1724_v19, 0.0 }
 0x398   :  { %v1759_v31 = vmul.f32 %v4118_v11, %v1724_v19  ;;  %vm1741_vm13 = vcmp.ge.f32.partialorder %v1719_v49, 0.0  ;;  %v1758_v23 = vmul.f32 %v4118_v11, %v1719_v49  ;;  %v1801_v22 = vsel %vm563_vm2, %v4227_v16, 0.0 }
 0x399   :  { %v1800_v61 = vadd.f32 %v1799_v29, %v1798_v18  ;;  %v1852_v13 = vadd.f32 %v1851_v46, %v1850_v42  ;;  %v1853_v58 = vsel %vm563_vm2, %v1826_v39, 0.0  ;;  %v1855_v3 = vsel %vm563_vm2, %v1827_v6, 0.0 }
 0x39a   :  { %v4247_v26 = vsel %vm1742_vm12, %v1724_v19, %v1759_v31  ;;  %v4252_v60 = vsel %vm1741_vm13, %v1719_v49, %v1758_v23  ;;  %vm2064_vm15 = vcmask 1045504  }
 0x39b   :  { %v1854_v40 = vadd.f32 %v1853_v58, %v1852_v13  ;;  %v1829_v48 = vmul.f32 %v4247_v26, %v4247_v26  ;;  %v1802_v53 = vadd.f32 %v1801_v22, %v1800_v61  ;;  %v1803_v27 = vsel %vm563_vm2, %v4252_v60, 0.0 }
 0x39c   :  { %v1828_v11 = vmul.f32 %v4252_v60, %v4252_v60  ;;  %v1805_v46 = vsel %vm563_vm2, %v4247_v26, 0.0 }
 0x39d   :  { %v1856_v34 = vadd.f32 %v1855_v3, %v1854_v40  ;;  %v1804_v28 = vadd.f32 %v1803_v27, %v1802_v53  ;;  %v1859_v1 = vsel %vm563_vm2, %v1829_v48, 0.0 }
 0x39e   :  { %v1857_v4 = vsel %vm563_vm2, %v1828_v11, 0.0 }
 0x39f   :  { %v1858_v9 = vadd.f32 %v1857_v4, %v1856_v34  ;;  %v1806_v52 = vadd.f32 %v1805_v46, %v1804_v28 }
 0x3a1   :  { %v1860_v19 = vadd.f32 %v1859_v1, %v1858_v9  ;;  %v1807_v49 = vrot.slane %v1806_v52, 4 }
 0x3a3   :  { %v1861_v42 = vrot.slane %v1860_v19, 4  ;;  %v1808_v6 = vadd.f32 %v1807_v49, %v1806_v52  ;;  %v1889_v52 = vld [vmem:[%s4871_s17] sm:$0x1] }
 0x3a4   :  { %v1934_v49 = vld [vmem:[%s4867_s13] sm:$0x7]  ;;  %s2795_s13 = sld [smem:[#allocation2 + $0x3]] }
 0x3a5   :  { %v1862_v18 = vadd.f32 %v1861_v42, %v1860_v19  ;;  %v1809_v29 = vrot.slane %v1808_v6, 2 }
 0x3a7   :  { %v1863_v39 = vrot.slane %v1862_v18, 2  ;;  %v1810_v31 = vadd.f32 %v1809_v29, %v1808_v6  ;;  %v4307_v6 = vrot.slane %v1934_v49, %v3489_v32  ;;  %v4314_v29 = vrot.slane %v1934_v49, %v987_v33 }
 0x3a9   :  { %v1864_v61 = vadd.f32 %v1863_v39, %v1862_v18  ;;  %v1811_v13 = vrot.slane %v1810_v31, 1  ;;  %v4925_v39 = vsub.s32 2, %v3480_v62 }
 0x3ab   :  { %v1865_v23 = vrot.slane %v1864_v61, 1  ;;  %v1812_v58 = vadd.f32 %v1811_v13, %v1810_v31  ;;  %v4318_v31 = vrot.slane %v1934_v49, %v4925_v39 }
 0x3ad   :  { %v1866_v22 = vadd.f32 %v1865_v23, %v1864_v61  ;;  %v4264_v3 = vmul.f32 0.0078125, %v1812_v58  ;;  %v4323_v61 = vld [vmem:[%s4872_s18] ss:$0 sm:$0xff] }
 0x3af   :  { %v1867_v40 = vmul.f32 0.0078125, %v1866_v22  ;;  %v1868_v48 = vmul.f32 %v4264_v3, %v4264_v3  ;;  %v1881_v53 = vsub.f32 %v4221_v57, %v4264_v3  ;;  %v1882_v27 = vsub.f32 %v4205_v41, %v4264_v3 }
 0x3b0   :  { %v1883_v11 = vsub.f32 %v4234_v45, %v4264_v3  ;;  %v1884_v34 = vsub.f32 %v4227_v16, %v4264_v3  ;;  %v1885_v28 = vsub.f32 %v4252_v60, %v4264_v3  ;;  %v1886_v4 = vsub.f32 %v4247_v26, %v4264_v3 }
 0x3b1   :  { %v1871_v46 = vsub.f32 %v4131_v59, %v4264_v3  ;;  %v1869_v9 = vsub.f32 %v1867_v40, %v1868_v48  ;;  %v1872_v57 = vsub.f32 %v4124_v37, %v4264_v3  ;;  %v1873_v41 = vsub.f32 %v4147_v14, %v4264_v3 }
 0x3b2   :  { %v1874_v45 = vsub.f32 %v4142_v38, %v4264_v3  ;;  %v4926_v22 = vand.u32 63, %v3483_v30 }
 0x3b3   :  { %v1870_v1 = vmax.f32 %v1869_v9, 0.0 }
 0x3b4   :  { %vm4331_vm1 = vcmp.lt.s32.totalorder %v4926_v22, 62 }
 0x3b5   :  { %v1887_v38 = vadd.f32 1e-05, %v1870_v1 }
 0x3b7   :  { %3058 = vrsqrt.f32 %v1887_v38 }
 0x3c1   :  { %v3059_v19 = vpop.eup %3058 }
 0x3c2   :  { %v1890_v42 = vmul.f32 %v3059_v19, %v1889_v52 }
 0x3c4   :  { %v4310_v18 = vrot.slane %v1890_v42, %v3489_v32 }
 0x3c6   :  { %v1905_v13 = vmul.f32 %v4310_v18, %v1881_v53  ;;  %v1906_v23 = vmul.f32 %v4310_v18, %v1882_v27  ;;  %v1907_v58 = vmul.f32 %v4310_v18, %v1883_v11  ;;  %v1908_v33 = vmul.f32 %v4310_v18, %v1884_v34 }
 0x3c7   :  { %v1909_v48 = vmul.f32 %v4310_v18, %v1885_v28  ;;  %v1910_v9 = vmul.f32 %v4310_v18, %v1886_v4  ;;  %v4338_v1 = vmul.f32 %v4310_v18, %v1871_v46  ;;  %v4341_v53 = vmul.f32 %v4310_v18, %v1872_v57 }
 0x3c8   :  { %v4344_v27 = vadd.f32 %v4323_v61, %v1905_v13  ;;  %v1929_v11 = vadd.f32 %v4323_v61, %v1906_v23  ;;  %v1930_v30 = vadd.f32 %v4323_v61, %v1907_v58  ;;  %v1931_v34 = vadd.f32 %v4323_v61, %v1908_v33 }
 0x3c9   :  { %v1932_v38 = vadd.f32 %v4323_v61, %v1909_v48  ;;  %v1933_v28 = vadd.f32 %v4323_v61, %v1910_v9  ;;  %v1897_v4 = vmul.f32 %v4310_v18, %v1873_v41  ;;  %v1898_v46 = vmul.f32 %v4310_v18, %v1874_v45 }
 0x3ca   :  { %v4885_v57 = vrot.slane %v4344_v27, 6  ;;  %v1973_v52 = vrot.slane %v1929_v11, 6  ;;  %v1975_v19 = vrot.slane %v1930_v30, 6  ;;  %v1977_v49 = vrot.slane %v1931_v34, 6 }
 0x3cb   :  { %v1979_v42 = vrot.slane %v1932_v38, 6  ;;  %v1981_v39 = vrot.slane %v1933_v28, 6  ;;  %v4886_v13 = vrot.slane %v4344_v27, 2  ;;  %v2086_v23 = vrot.slane %v1929_v11, 2 }
 0x3cc   :  { %v1974_v58 = vsel %vm1951_vm14, %v4885_v57, %v1973_v52  ;;  %v1976_v33 = vsel %vm1951_vm14, %v1973_v52, %v1975_v19  ;;  %v1978_v41 = vsel %vm1951_vm14, %v1975_v19, %v1977_v49  ;;  %v2088_v22 = vrot.slane %v1930_v30, 2 }
 0x3cd   :  { %v1980_v45 = vsel %vm1951_vm14, %v1977_v49, %v1979_v42  ;;  %v1982_v48 = vsel %vm1951_vm14, %v1979_v42, %v1981_v39  ;;  %v4365_v9 = vsel %vm2064_vm15, %v4886_v13, %v2086_v23  ;;  %v2090_v14 = vrot.slane %v1931_v34, 2 }
 0x3ce   :  { %v2089_v37 = vsel %vm2064_vm15, %v2086_v23, %v2088_v22  ;;  %v2092_v59 = vrot.slane %v1932_v38, 2  ;;  %v2094_v26 = vrot.slane %v1933_v28, 2  ;;  %v2192_v57 = vmul.f32 %v4307_v6, %v1974_v58 }
 0x3cf   :  { %v2091_v52 = vsel %vm2064_vm15, %v2088_v22, %v2090_v14  ;;  %v2193_v19 = vmul.f32 %v4307_v6, %v1976_v33  ;;  %v2194_v49 = vmul.f32 %v4307_v6, %v1978_v41  ;;  %v2195_v42 = vmul.f32 %v4307_v6, %v1980_v45 }
 0x3d0   :  { %v2093_v39 = vsel %vm2064_vm15, %v2090_v14, %v2092_v59  ;;  %v2095_v13 = vsel %vm2064_vm15, %v2092_v59, %v2094_v26  ;;  %v2112_v60 = vsel %vm2064_vm15, %v2094_v26, 0.0  ;;  %v2196_v23 = vmul.f32 %v4307_v6, %v1982_v48 }
 0x3d1   :  { %v2176_v16 = vsel %vm4331_vm1, %v2112_v60, 0.0  ;;  %v2212_v58 = vmul.f32 %v4314_v29, %v1929_v11  ;;  %v2213_v22 = vmul.f32 %v4314_v29, %v1930_v30  ;;  %v2214_v33 = vmul.f32 %v4314_v29, %v1931_v34 }
 0x3d2   :  { %v2215_v41 = vmul.f32 %v4314_v29, %v1932_v38  ;;  %v2216_v45 = vmul.f32 %v4314_v29, %v1933_v28  ;;  %v2248_v14 = vmul.f32 %v4318_v31, %v2089_v37  ;;  %v2249_v59 = vmul.f32 %v4318_v31, %v2091_v52 }
 0x3d3   :  { %v2228_v26 = vadd.f32 %v2212_v58, %v2192_v57  ;;  %v2229_v2 = vadd.f32 %v2213_v22, %v2193_v19  ;;  %v2230_v48 = vadd.f32 %v2214_v33, %v2194_v49  ;;  %v2250_v40 = vmul.f32 %v4318_v31, %v2093_v39 }
 0x3d4   :  { %v2231_v60 = vadd.f32 %v2215_v41, %v2195_v42  ;;  %v2232_v5 = vadd.f32 %v2216_v45, %v2196_v23  ;;  %v2251_v11 = vmul.f32 %v4318_v31, %v2095_v13  ;;  %v2252_v30 = vmul.f32 %v4318_v31, %v2176_v16 }
 0x3d5   :  { %v4389_v34 = vadd.f32 %v2248_v14, %v2228_v26  ;;  %v4391_v38 = vadd.f32 %v2249_v59, %v2229_v2  ;;  %v4393_v28 = vadd.f32 %v2250_v40, %v2230_v48  ;;  %v4929_v37 = vsub.f32 %v4167_v44, %v4264_v3 }
 0x3d6   :  { %v4399_v52 = vadd.f32 %v2251_v11, %v2231_v60  ;;  %v4401_v19 = vadd.f32 %v2252_v30, %v2232_v5  ;;  %v4930_v13 = vsub.f32 %v4156_v54, %v4264_v3  ;;  %v4931_v2 = vsub.f32 %v4185_v43, %v4264_v3 }
 0x3d7   :  { %v1899_v57 = vmul.f32 %v4310_v18, %v4929_v37  ;;  %v4932_v42 = vsub.f32 %v4169_v7, %v4264_v3  ;;  %v4933_v39 = vsub.f32 %v4203_v24, %v4264_v3  ;;  %v4934_v54 = vsub.f32 %v4194_v15, %v4264_v3 }
 0x3d8   :  { %v1900_v16 = vmul.f32 %v4310_v18, %v4930_v13  ;;  %v1901_v49 = vmul.f32 %v4310_v18, %v4931_v2  ;;  %v4425_v43 = vadd.f32 %v4323_v61, %v4338_v1  ;;  %v4429_v58 = vadd.f32 %v4323_v61, %v4341_v53 }
 0x3d9   :  { %v1902_v44 = vmul.f32 %v4310_v18, %v4932_v42  ;;  %v1903_v5 = vmul.f32 %v4310_v18, %v4933_v39  ;;  %v1904_v23 = vmul.f32 %v4310_v18, %v4934_v54  ;;  %v4432_v7 = vadd.f32 %v4323_v61, %v1897_v4 }
 0x3da   :  { %v4435_v24 = vadd.f32 %v4323_v61, %v1898_v46  ;;  %v4438_v22 = vadd.f32 %v4323_v61, %v1899_v57  ;;  %v4935_v15 = vand.u32 63, %v3480_v62  ;;  %v4447_v18 = vadd.f32 %v4323_v61, %v1900_v16 }
 0x3db   :  { %v4450_v1 = vadd.f32 %v4323_v61, %v1901_v49  ;;  %v4938_v53 = vand.u32 63, %v3594_v12  ;;  %v4459_v46 = vadd.f32 %v4323_v61, %v1902_v44  ;;  %v4462_v62 = vadd.f32 %v4323_v61, %v1903_v5 }
 0x3dc   :  { %vm4442_vm3 = vcmp.ge.s32.totalorder %v4935_v15, 2  ;;  %v4465_v33 = vadd.f32 %v4323_v61, %v1904_v23  ;;  %v4941_v41 = vand.u32 63, %v3601_v17  ;;  %v1952_v12 = vrot.slane %v4425_v43, 6 }
 0x3dd   :  { %vm4454_vm4 = vcmp.ge.s32.totalorder %v4938_v53, 2  ;;  %v1953_v14 = vrot.slane %v4429_v58, 6  ;;  %v1955_v59 = vrot.slane %v4432_v7, 6  ;;  %v1957_v26 = vrot.slane %v4435_v24, 6 }
 0x3de   :  { %vm4469_vm5 = vcmp.lt.s32.totalorder %v4941_v41, 62  ;;  %v1959_v48 = vrot.slane %v4438_v22, 6  ;;  %v1961_v40 = vrot.slane %v4447_v18, 6  ;;  %v1963_v61 = vrot.slane %v4450_v1, 6 }
 0x3df   :  { %v1965_v17 = vrot.slane %v4459_v46, 6  ;;  %v1954_v60 = vsel %vm1951_vm14, %v1952_v12, %v1953_v14  ;;  %v1956_v11 = vsel %vm1951_vm14, %v1953_v14, %v1955_v59  ;;  %v1958_v30 = vsel %vm1951_vm14, %v1955_v59, %v1957_v26 }
 0x3e0   :  { %v1967_v37 = vrot.slane %v4462_v62, 6  ;;  %v1960_v57 = vsel %vm1951_vm14, %v1957_v26, %v1959_v48  ;;  %v1962_v13 = vsel %vm1951_vm14, %v1959_v48, %v1961_v40  ;;  %v1964_v16 = vsel %vm1951_vm14, %v1961_v40, %v1963_v61 }
 0x3e1   :  { %v1966_v2 = vsel %vm1951_vm14, %v1963_v61, %v1965_v17  ;;  %v1969_v42 = vrot.slane %v4465_v33, 6  ;;  %v1999_v44 = vsel %vm1951_vm14, 0.0, %v1952_v12  ;;  %v2065_v39 = vrot.slane %v4425_v43, 2 }
 0x3e2   :  { %v1968_v49 = vsel %vm1951_vm14, %v1965_v17, %v1967_v37  ;;  %v2048_v5 = vsel %vm4442_vm3, %v1999_v44, 0.0  ;;  %v2066_v23 = vrot.slane %v4429_v58, 2  ;;  %v2068_v15 = vrot.slane %v4432_v7, 2 }
 0x3e3   :  { %v2056_v54 = vsel %vm4454_vm4, %v1968_v49, 0.0  ;;  %v1970_v53 = vsel %vm1951_vm14, %v1967_v37, %v1969_v42  ;;  %v4944_v41 = vrot.slane %v4344_v27, 6  ;;  %v2070_v12 = vrot.slane %v4435_v24, 2 }
 0x3e4   :  { %v2072_v59 = vrot.slane %v4438_v22, 2  ;;  %v2067_v3 = vsel %vm2064_vm15, %v2065_v39, %v2066_v23  ;;  %v2069_v26 = vsel %vm2064_vm15, %v2066_v23, %v2068_v15  ;;  %v2074_v4 = vrot.slane %v4447_v18, 2 }
 0x3e5   :  { %v1972_v14 = vsel %vm1951_vm14, %v1969_v42, %v4944_v41  ;;  %v2076_v48 = vrot.slane %v4450_v1, 2  ;;  %v2071_v40 = vsel %vm2064_vm15, %v2068_v15, %v2070_v12  ;;  %v2078_v17 = vrot.slane %v4459_v46, 2 }
 0x3e6   :  { %v2073_v61 = vsel %vm2064_vm15, %v2070_v12, %v2072_v59  ;;  %v2080_v37 = vrot.slane %v4462_v62, 2  ;;  %v2075_v49 = vsel %vm2064_vm15, %v2072_v59, %v2074_v4  ;;  %v2082_v44 = vrot.slane %v4465_v33, 2 }
 0x3e7   :  { %v2077_v42 = vsel %vm2064_vm15, %v2074_v4, %v2076_v48  ;;  %v2181_v39 = vmul.f32 %v4307_v6, %v2048_v5  ;;  %v2079_v23 = vsel %vm2064_vm15, %v2076_v48, %v2078_v17  ;;  %v2182_v15 = vmul.f32 %v4307_v6, %v1954_v60 }
 0x3e8   :  { %v2081_v41 = vsel %vm2064_vm15, %v2078_v17, %v2080_v37  ;;  %v2183_v12 = vmul.f32 %v4307_v6, %v1956_v11  ;;  %v2083_v47 = vsel %vm2064_vm15, %v2080_v37, %v2082_v44  ;;  %v4945_v36 = vrot.slane %v4344_v27, 2 }
 0x3e9   :  { %v2168_v4 = vsel %vm4469_vm5, %v2081_v41, 0.0  ;;  %v2184_v50 = vmul.f32 %v4307_v6, %v1958_v30  ;;  %v2185_v5 = vmul.f32 %v4307_v6, %v1960_v57  ;;  %v2186_v48 = vmul.f32 %v4307_v6, %v1962_v13 }
 0x3ea   :  { %v2085_v59 = vsel %vm2064_vm15, %v2082_v44, %v4945_v36  ;;  %v2187_v17 = vmul.f32 %v4307_v6, %v1964_v16  ;;  %v2188_v60 = vmul.f32 %v4307_v6, %v1966_v2  ;;  %v2189_v11 = vmul.f32 %v4307_v6, %v2056_v54 }
 0x3eb   :  { %v2190_v37 = vmul.f32 %v4307_v6, %v1970_v53  ;;  %v2191_v20 = vmul.f32 %v4307_v6, %v1972_v14  ;;  %v2201_v36 = vmul.f32 %v4314_v29, %v4425_v43  ;;  %v2202_v45 = vmul.f32 %v4314_v29, %v4429_v58 }
 0x3ec   :  { %v2203_v30 = vmul.f32 %v4314_v29, %v4432_v7  ;;  %v2204_v57 = vmul.f32 %v4314_v29, %v4435_v24  ;;  %v2205_v13 = vmul.f32 %v4314_v29, %v4438_v22  ;;  %v2206_v16 = vmul.f32 %v4314_v29, %v4447_v18 }
 0x3ed   :  { %v2207_v6 = vmul.f32 %v4314_v29, %v4450_v1  ;;  %v2208_v43 = vmul.f32 %v4314_v29, %v4459_v46  ;;  %v2209_v58 = vmul.f32 %v4314_v29, %v4462_v62  ;;  %v2210_v7 = vmul.f32 %v4314_v29, %v4465_v33 }
 0x3ee   :  { %v2211_v24 = vmul.f32 %v4314_v29, %v4344_v27  ;;  %v2217_v2 = vadd.f32 %v2201_v36, %v2181_v39  ;;  %v2218_v22 = vadd.f32 %v2202_v45, %v2182_v15  ;;  %v2219_v54 = vadd.f32 %v2203_v30, %v2183_v12 }
 0x3ef   :  { %v2220_v53 = vadd.f32 %v2204_v57, %v2184_v50  ;;  %v2221_v18 = vadd.f32 %v2205_v13, %v2185_v5  ;;  %v2222_v14 = vadd.f32 %v2206_v16, %v2186_v48  ;;  %v2223_v44 = vadd.f32 %v2207_v6, %v2187_v17 }
 0x3f0   :  { %v2224_v1 = vadd.f32 %v2208_v43, %v2188_v60  ;;  %v2225_v41 = vadd.f32 %v2209_v58, %v2189_v11  ;;  %v2226_v55 = vadd.f32 %v2210_v7, %v2190_v37  ;;  %v2227_v46 = vadd.f32 %v2211_v24, %v2191_v20 }
 0x3f1   :  { %v2237_v62 = vmul.f32 %v4318_v31, %v2067_v3  ;;  %v2238_v0 = vmul.f32 %v4318_v31, %v2069_v26  ;;  %v2239_v33 = vmul.f32 %v4318_v31, %v2071_v40  ;;  %v2240_v29 = vmul.f32 %v4318_v31, %v2073_v61  ;;  %v2814_v61 = vld [vmem:[%s4868_s14] ss:$0 sm:$0xff] }
 0x3f2   :  { %v2241_v27 = vmul.f32 %v4318_v31, %v2075_v49  ;;  %v2242_v50 = vmul.f32 %v4318_v31, %v2077_v42  ;;  %v2243_v39 = vmul.f32 %v4318_v31, %v2079_v23  ;;  %v2244_v15 = vmul.f32 %v4318_v31, %v2168_v4 }
 0x3f3   :  { %v2245_v12 = vmul.f32 %v4318_v31, %v2083_v47  ;;  %v2246_v20 = vmul.f32 %v4318_v31, %v2085_v59  ;;  %v2247_v3 = vmul.f32 %v4318_v31, %v4365_v9  ;;  %v2253_v26 = vadd.f32 %v2237_v62, %v2217_v2 }
 0x3f4   :  { %v2254_v5 = vadd.f32 %v2238_v0, %v2218_v22  ;;  %v2255_v40 = vadd.f32 %v2239_v33, %v2219_v54  ;;  %v2256_v48 = vadd.f32 %v2240_v29, %v2220_v53  ;;  %v2257_v49 = vadd.f32 %v2241_v27, %v2221_v18 }
 0x3f5   :  { %v2258_v42 = vadd.f32 %v2242_v50, %v2222_v14  ;;  %v2259_v23 = vadd.f32 %v2243_v39, %v2223_v44  ;;  %v2260_v17 = vadd.f32 %v2244_v15, %v2224_v1  ;;  %v2261_v4 = vadd.f32 %v2245_v12, %v2225_v41 }
 0x3f6   :  { %v2262_v60 = vadd.f32 %v2246_v20, %v2226_v55  ;;  %v2263_v47 = vadd.f32 %v2247_v3, %v2227_v46  ;;  %v2276_v11 = vadd.f32 %v2814_v61, %v2253_v26  ;;  %v2277_v59 = vadd.f32 %v2814_v61, %v2254_v5 }
 0x3f7   :  { %v4572_v37 = vstv %s2795_s13  ;;  %v2278_v31 = vadd.f32 %v2814_v61, %v2255_v40  ;;  %v2279_v9 = vadd.f32 %v2814_v61, %v2256_v48  ;;  %v2280_v45 = vadd.f32 %v2814_v61, %v2257_v49 }
 0x3f8   :  { %vm2292_vm6 = vcmp.ge.f32.partialorder %v2276_v11, 0.0  ;;  %vm2293_vm7 = vcmp.ge.f32.partialorder %v2277_v59, 0.0  ;;  %v2309_v0 = vmul.f32 %v4572_v37, %v2276_v11  ;;  %v2310_v36 = vmul.f32 %v4572_v37, %v2277_v59 }
 0x3f9   :  { %v2311_v30 = vmul.f32 %v4572_v37, %v2278_v31  ;;  %vm2294_vm8 = vcmp.ge.f32.partialorder %v2278_v31, 0.0  ;;  %v2281_v57 = vadd.f32 %v2814_v61, %v2258_v42  ;;  %v2312_v55 = vmul.f32 %v4572_v37, %v2279_v9 }
 0x3fa   :  { %v4578_v13 = vsel %vm2292_vm6, %v2276_v11, %v2309_v0  ;;  %v4580_v16 = vsel %vm2293_vm7, %v2277_v59, %v2310_v36  ;;  %v4583_v6 = vadd.f32 %v2814_v61, %v4389_v34  ;;  %vm2295_vm9 = vcmp.ge.f32.partialorder %v2279_v9, 0.0 }
 0x3fb   :  { %v4586_v43 = vadd.f32 %v2814_v61, %v4391_v38  ;;  %v2282_v58 = vadd.f32 %v2814_v61, %v2259_v23  ;;  %v2313_v7 = vmul.f32 %v4572_v37, %v2280_v45  ;;  %v4589_v24 = vsel %vm2294_vm8, %v2278_v31, %v2311_v30 }
 0x3fc   :  { %v4592_v2 = vadd.f32 %v2814_v61, %v4393_v28  ;;  %vm2296_vm10 = vcmp.ge.f32.partialorder %v2280_v45, 0.0  ;;  %v2341_v22 = vsel %vm563_vm2, %v4578_v13, 0.0  ;;  %v2342_v34 = vsel %vm563_vm2, %v4580_v16, 0.0 }
 0x3fd   :  { %v2283_v54 = vadd.f32 %v2814_v61, %v2260_v17  ;;  %v2314_v53 = vmul.f32 %v4572_v37, %v2281_v57  ;;  %v4599_v38 = vsel %vm2295_vm9, %v2279_v9, %v2312_v55  ;;  %v2343_v18 = vadd.f32 %v2342_v34, %v2341_v22 }
 0x3fe   :  { %v4602_v14 = vadd.f32 %v2814_v61, %v4399_v52  ;;  %v4605_v44 = vadd.f32 %v2814_v61, %v4401_v19  ;;  %vm2297_vm11 = vcmp.ge.f32.partialorder %v2281_v57, 0.0  ;;  %v2344_v28 = vsel %vm563_vm2, %v4589_v24, 0.0 }
 0x3ff   :  { %v2284_v1 = vadd.f32 %v2814_v61, %v2261_v4  ;;  %v2315_v41 = vmul.f32 %v4572_v37, %v2282_v58  ;;  %v4610_v46 = vsel %vm2296_vm10, %v2280_v45, %v2313_v7  ;;  %v2345_v62 = vadd.f32 %v2344_v28, %v2343_v18 }
 0x400   :  { %vm2298_vm12 = vcmp.ge.f32.partialorder %v2282_v58, 0.0  ;;  %v2346_v33 = vsel %vm563_vm2, %v4599_v38, 0.0  ;;  %v2379_v52 = vmul.f32 %v4578_v13, %v4578_v13  ;;  %v2380_v19 = vmul.f32 %v4580_v16, %v4580_v16 }
 0x401   :  { %v2285_v29 = vadd.f32 %v2814_v61, %v2262_v60  ;;  %v2316_v27 = vmul.f32 %v4572_v37, %v2283_v54  ;;  %v4619_v50 = vsel %vm2297_vm11, %v2281_v57, %v2314_v53  ;;  %v2347_v39 = vadd.f32 %v2346_v33, %v2345_v62 }
 0x402   :  { %v2286_v15 = vadd.f32 %v2814_v61, %v2263_v47  ;;  %vm2299_vm13 = vcmp.ge.f32.partialorder %v2283_v54, 0.0  ;;  %v2348_v12 = vsel %vm563_vm2, %v4610_v46, 0.0  ;;  %v2381_v20 = vmul.f32 %v4589_v24, %v4589_v24 }
 0x403   :  { %v2317_v3 = vmul.f32 %v4572_v37, %v2284_v1  ;;  %v4626_v26 = vsel %vm2298_vm12, %v2282_v58, %v2315_v41  ;;  %v2349_v5 = vadd.f32 %v2348_v12, %v2347_v39  ;;  %v2395_v40 = vsel %vm563_vm2, %v2379_v52, 0.0 }
 0x404   :  { %vm2300_vm14 = vcmp.ge.f32.partialorder %v2284_v1, 0.0  ;;  %v2350_v48 = vsel %vm563_vm2, %v4619_v50, 0.0  ;;  %v2382_v61 = vmul.f32 %v4599_v38, %v4599_v38  ;;  %v2396_v49 = vsel %vm563_vm2, %v2380_v19, 0.0 }
 0x405   :  { %v2318_v42 = vmul.f32 %v4572_v37, %v2285_v29  ;;  %v4635_v23 = vsel %vm2299_vm13, %v2283_v54, %v2316_v27  ;;  %v2351_v17 = vadd.f32 %v2350_v48, %v2349_v5  ;;  %v2397_v4 = vadd.f32 %v2396_v49, %v2395_v40 }
 0x406   :  { %vm2301_vm15 = vcmp.ge.f32.partialorder %v2285_v29, 0.0  ;;  %v2352_v60 = vsel %vm563_vm2, %v4626_v26, 0.0  ;;  %v2383_v47 = vmul.f32 %v4610_v46, %v4610_v46  ;;  %v2398_v11 = vsel %vm563_vm2, %v2381_v20, 0.0 }
 0x407   :  { %v2319_v59 = vmul.f32 %v4572_v37, %v2286_v15  ;;  %v4643_v31 = vsel %vm2300_vm14, %v2284_v1, %v2317_v3  ;;  %v2353_v9 = vadd.f32 %v2352_v60, %v2351_v17  ;;  %v2399_v0 = vadd.f32 %v2398_v11, %v2397_v4 }
 0x408   :  { %vm2302_vm1 = vcmp.ge.f32.partialorder %v2286_v15, 0.0  ;;  %v2354_v36 = vsel %vm563_vm2, %v4635_v23, 0.0  ;;  %v2384_v45 = vmul.f32 %v4619_v50, %v4619_v50  ;;  %v2400_v30 = vsel %vm563_vm2, %v2382_v61, 0.0 }
 0x409   :  { %v2320_v57 = vmul.f32 %v4572_v37, %v4583_v6  ;;  %v4652_v55 = vsel %vm2301_vm15, %v2285_v29, %v2318_v42  ;;  %v2355_v58 = vadd.f32 %v2354_v36, %v2353_v9  ;;  %v2401_v7 = vadd.f32 %v2400_v30, %v2399_v0 }
 0x40a   :  { %vm2303_vm3 = vcmp.ge.f32.partialorder %v4583_v6, 0.0  ;;  %v2356_v22 = vsel %vm563_vm2, %v4643_v31, 0.0  ;;  %v2385_v34 = vmul.f32 %v4626_v26, %v4626_v26  ;;  %v2402_v54 = vsel %vm563_vm2, %v2383_v47, 0.0 }
 0x40b   :  { %v2321_v53 = vmul.f32 %v4572_v37, %v4586_v43  ;;  %v4662_v18 = vsel %vm2302_vm1, %v2286_v15, %v2319_v59  ;;  %v2357_v28 = vadd.f32 %v2356_v22, %v2355_v58  ;;  %v2403_v1 = vadd.f32 %v2402_v54, %v2401_v7 }
 0x40c   :  { %vm2304_vm4 = vcmp.ge.f32.partialorder %v4586_v43, 0.0  ;;  %v2358_v41 = vsel %vm563_vm2, %v4652_v55, 0.0  ;;  %v2386_v62 = vmul.f32 %v4635_v23, %v4635_v23  ;;  %v2404_v33 = vsel %vm563_vm2, %v2384_v45, 0.0 }
 0x40d   :  { %v2322_v52 = vmul.f32 %v4572_v37, %v4592_v2  ;;  %v4673_v19 = vsel %vm2303_vm3, %v4583_v6, %v2320_v57  ;;  %v2359_v29 = vadd.f32 %v2358_v41, %v2357_v28  ;;  %v2405_v27 = vadd.f32 %v2404_v33, %v2403_v1 }
 0x40e   :  { %vm2305_vm5 = vcmp.ge.f32.partialorder %v4592_v2, 0.0  ;;  %v2360_v39 = vsel %vm563_vm2, %v4662_v18, 0.0  ;;  %v2387_v15 = vmul.f32 %v4643_v31, %v4643_v31  ;;  %v2406_v12 = vsel %vm563_vm2, %v2385_v34, 0.0 }
 0x40f   :  { %v2323_v20 = vmul.f32 %v4572_v37, %v4602_v14  ;;  %v4684_v3 = vsel %vm2304_vm4, %v4586_v43, %v2321_v53  ;;  %v2361_v6 = vadd.f32 %v2360_v39, %v2359_v29  ;;  %v2407_v5 = vadd.f32 %v2406_v12, %v2405_v27 }
 0x410   :  { %vm2306_vm6 = vcmp.ge.f32.partialorder %v4602_v14, 0.0  ;;  %v2362_v40 = vsel %vm563_vm2, %v4673_v19, 0.0  ;;  %v2388_v48 = vmul.f32 %v4652_v55, %v4652_v55  ;;  %v2408_v61 = vsel %vm563_vm2, %v2386_v62, 0.0 }
 0x411   :  { %v2324_v49 = vmul.f32 %v4572_v37, %v4605_v44  ;;  %v4695_v42 = vsel %vm2305_vm5, %v4592_v2, %v2322_v52  ;;  %v2363_v43 = vadd.f32 %v2362_v40, %v2361_v6  ;;  %v2409_v17 = vadd.f32 %v2408_v61, %v2407_v5 }
 0x412   :  { %vm2307_vm7 = vcmp.ge.f32.partialorder %v4605_v44, 0.0  ;;  %v2364_v4 = vsel %vm563_vm2, %v4684_v3, 0.0  ;;  %v2389_v60 = vmul.f32 %v4662_v18, %v4662_v18  ;;  %v2410_v47 = vsel %vm563_vm2, %v2387_v15, 0.0 }
 0x413   :  { %v4704_v11 = vsel %vm2306_vm6, %v4602_v14, %v2323_v20  ;;  %v2365_v59 = vadd.f32 %v2364_v4, %v2363_v43  ;;  %v2411_v37 = vadd.f32 %v2410_v47, %v2409_v17  ;;  %v2366_v2 = vsel %vm563_vm2, %v4695_v42, 0.0 }
 0x414   :  { %v2390_v9 = vmul.f32 %v4673_v19, %v4673_v19  ;;  %v2412_v0 = vsel %vm563_vm2, %v2388_v48, 0.0  ;;  %v4712_v36 = vsel %vm2307_vm7, %v4605_v44, %v2324_v49  ;;  %v2368_v57 = vsel %vm563_vm2, %v4704_v11, 0.0 }
 0x415   :  { %v2367_v45 = vadd.f32 %v2366_v2, %v2365_v59  ;;  %v2413_v30 = vadd.f32 %v2412_v0, %v2411_v37  ;;  %v2391_v14 = vmul.f32 %v4684_v3, %v4684_v3  ;;  %v2414_v58 = vsel %vm563_vm2, %v2389_v60, 0.0 }
 0x416   :  { %v2370_v34 = vsel %vm563_vm2, %v4712_v36, 0.0  ;;  %v2392_v54 = vmul.f32 %v4695_v42, %v4695_v42  ;;  %v2416_v44 = vsel %vm563_vm2, %v2390_v9, 0.0  ;;  %v2393_v1 = vmul.f32 %v4704_v11, %v4704_v11 }
 0x417   :  { %v2369_v7 = vadd.f32 %v2368_v57, %v2367_v45  ;;  %v2415_v22 = vadd.f32 %v2414_v58, %v2413_v30  ;;  %v2418_v41 = vsel %vm563_vm2, %v2391_v14, 0.0  ;;  %v2394_v52 = vmul.f32 %v4712_v36, %v4712_v36 }
 0x418   :  { %v2420_v29 = vsel %vm563_vm2, %v2392_v54, 0.0  ;;  %v2422_v15 = vsel %vm563_vm2, %v2393_v1, 0.0 }
 0x419   :  { %v2371_v53 = vadd.f32 %v2370_v34, %v2369_v7  ;;  %v2417_v28 = vadd.f32 %v2416_v44, %v2415_v22  ;;  %v2424_v6 = vsel %vm563_vm2, %v2394_v52, 0.0 }
 0x41b   :  { %v2372_v62 = vrot.slane %v2371_v53, 4  ;;  %v2419_v33 = vadd.f32 %v2418_v41, %v2417_v28 }
 0x41d   :  { %v2373_v27 = vadd.f32 %v2372_v62, %v2371_v53  ;;  %v2421_v39 = vadd.f32 %v2420_v29, %v2419_v33 }
 0x41f   :  { %v2374_v12 = vrot.slane %v2373_v27, 2  ;;  %v2423_v20 = vadd.f32 %v2422_v15, %v2421_v39 }
 0x421   :  { %v2375_v5 = vadd.f32 %v2374_v12, %v2373_v27  ;;  %v2425_v40 = vadd.f32 %v2424_v6, %v2423_v20 }
 0x423   :  { %v2376_v48 = vrot.slane %v2375_v5, 1  ;;  %v2426_v61 = vrot.slane %v2425_v40, 4 }
 0x425   :  { %v2377_v49 = vadd.f32 %v2376_v48, %v2375_v5  ;;  %v2427_v43 = vadd.f32 %v2426_v61, %v2425_v40 }
 0x427   :  { %v2378_v17 = vmul.f32 0.0078125, %v2377_v49  ;;  %v2428_v4 = vrot.slane %v2427_v43, 2 }
 0x429   :  { %v2429_v60 = vadd.f32 %v2428_v4, %v2427_v43  ;;  %v2436_v47 = vsub.f32 %v4578_v13, %v2378_v17  ;;  %v2437_v59 = vsub.f32 %v4580_v16, %v2378_v17  ;;  %v2438_v37 = vsub.f32 %v4589_v24, %v2378_v17 }
 0x42a   :  { %v2439_v2 = vsub.f32 %v4599_v38, %v2378_v17  ;;  %v2440_v9 = vsub.f32 %v4610_v46, %v2378_v17  ;;  %v2441_v0 = vsub.f32 %v4619_v50, %v2378_v17  ;;  %v2442_v30 = vsub.f32 %v4626_v26, %v2378_v17  ;;  %v2454_v50 = vld [vmem:[%s4873_s19] sm:$0x1] }
 0x42b   :  { %v2430_v45 = vrot.slane %v2429_v60, 1  ;;  %v2443_v57 = vsub.f32 %v4635_v23, %v2378_v17  ;;  %v2444_v14 = vsub.f32 %v4643_v31, %v2378_v17  ;;  %v2445_v58 = vsub.f32 %v4652_v55, %v2378_v17  ;;  %v2815_v55 = vld [vmem:[%s4874_s20] ss:$0 sm:$0xff] }
 0x42c   :  { %v2446_v13 = vsub.f32 %v4662_v18, %v2378_v17  ;;  %v2447_v16 = vsub.f32 %v4673_v19, %v2378_v17  ;;  %v2433_v7 = vmul.f32 %v2378_v17, %v2378_v17  ;;  %v2448_v52 = vsub.f32 %v4684_v3, %v2378_v17 }
 0x42d   :  { %v2431_v24 = vadd.f32 %v2430_v45, %v2429_v60  ;;  %v2449_v27 = vsub.f32 %v4695_v42, %v2378_v17  ;;  %v2451_v39 = vsub.f32 %v4712_v36, %v2378_v17 }
 0x42f   :  { %v2432_v38 = vmul.f32 0.0078125, %v2431_v24 }
 0x431   :  { %v2434_v22 = vsub.f32 %v2432_v38, %v2433_v7 }
 0x433   :  { %v2435_v46 = vmax.f32 %v2434_v22, 0.0 }
 0x435   :  { %v2452_v34 = vadd.f32 1e-05, %v2435_v46 }
 0x437   :  { %3060 = vrsqrt.f32 %v2452_v34 }
 0x441   :  { %v3061_v26 = vpop.eup %3060 }
 0x442   :  { %v2455_v23 = vmul.f32 %v3061_v26, %v2454_v50 }
 0x444   :  { %v2459_v31 = vrot.slane %v2455_v23, %v3489_v32  ;;  %v2450_v32 = vsub.f32 %v4704_v11, %v2378_v17 }
 0x446   :  { %v2460_v18 = vmul.f32 %v2459_v31, %v2436_v47  ;;  %v2461_v19 = vmul.f32 %v2459_v31, %v2437_v59  ;;  %v2462_v54 = vmul.f32 %v2459_v31, %v2438_v37  ;;  %v2463_v44 = vmul.f32 %v2459_v31, %v2439_v2 }
 0x447   :  { %v2464_v53 = vmul.f32 %v2459_v31, %v2440_v9  ;;  %v2465_v28 = vmul.f32 %v2459_v31, %v2441_v0  ;;  %v2466_v1 = vmul.f32 %v2459_v31, %v2442_v30  ;;  %v2467_v41 = vmul.f32 %v2459_v31, %v2443_v57  ;;  %v2832_v0 = vld [vmem:[%s4870_s16] ss:$0 sm:$0xff] }
 0x448   :  { %v2483_v62 = vadd.f32 %v2815_v55, %v2460_v18  ;;  %v2484_v33 = vadd.f32 %v2815_v55, %v2461_v19  ;;  %v2485_v29 = vadd.f32 %v2815_v55, %v2462_v54  ;;  %v2468_v15 = vmul.f32 %v2459_v31, %v2444_v14  ;;  %v4946_v18 = vld [vmem:[#allocation6_spill] sm:$0xff] }
 0x449   :  { %v2469_v12 = vmul.f32 %v2459_v31, %v2445_v58  ;;  %v2470_v20 = vmul.f32 %v2459_v31, %v2446_v13  ;;  %v2471_v6 = vmul.f32 %v2459_v31, %v2447_v16  ;;  %v2472_v5 = vmul.f32 %v2459_v31, %v2448_v52 }
 0x44a   :  { %3005 = vmatprep.mubr.msk.f32.mxu1 %vm563_vm2, %v2483_v62  ;;  %v2473_v40 = vmul.f32 %v2459_v31, %v2449_v27  ;;  %v2474_v48 = vmul.f32 %v2459_v31, %v2450_v32  ;;  %v2475_v61 = vmul.f32 %v2459_v31, %v2451_v39  ;;  %v2486_v3 = vadd.f32 %v2815_v55, %v2463_v44  ;;  %v4950_v39 = vld [vmem:[#allocation10_spill] sm:$0xff] }
 0x44b   :  { %3006 = vmatmul.mubr.msk.f32.vlgmr.msra.gmra.mrb[16].mxu1 %vm563_vm2, %v2484_v33  ;;  %v2487_v42 = vadd.f32 %v2815_v55, %v2464_v53  ;;  %v2488_v11 = vadd.f32 %v2815_v55, %v2465_v28  ;;  %v2489_v36 = vadd.f32 %v2815_v55, %v2466_v1  ;;  %v2490_v49 = vadd.f32 %v2815_v55, %v2467_v41  ;;  %v4948_v1 = vld [vmem:[#allocation8_spill] sm:$0xff]  ;;  %v4949_v33 = vld [vmem:[#allocation7_spill] sm:$0xff] }
 0x44c   :  { %3008 = vmatprep.mubr.msk.f32.mxu1 %vm563_vm2, %v2485_v29  ;;  %v2491_v43 = vadd.f32 %v2815_v55, %v2468_v15  ;;  %v2492_v17 = vadd.f32 %v2815_v55, %v2469_v12  ;;  %v2493_v4 = vadd.f32 %v2815_v55, %v2470_v20  ;;  %v2494_v60 = vadd.f32 %v2815_v55, %v2471_v6  ;;  %v4951_v20 = vld [vmem:[#allocation9_spill] sm:$0xff] }
 0x44d   :  { %v2495_v47 = vadd.f32 %v2815_v55, %v2472_v5  ;;  %v2496_v59 = vadd.f32 %v2815_v55, %v2473_v40  ;;  %v2497_v37 = vadd.f32 %v2815_v55, %v2474_v48  ;;  %v2498_v2 = vadd.f32 %v2815_v55, %v2475_v61  ;;  %v4952_v61 = vld [vmem:[#allocation12_spill] sm:$0xff] }
 0x44f   :  { %3009 = vmatmul.mubr.msk.f32.gmra.mrb[18].mxu1 %vm563_vm2, %v2486_v3 }
 0x450   :  { %3011 = vmatprep.mubr.msk.f32.mxu1 %vm563_vm2, %v2487_v42 }
 0x453   :  { %3012 = vmatmul.mubr.msk.f32.gmra.mrb[20].mxu1 %vm563_vm2, %v2488_v11  ;;  %v4953_v11 = vld [vmem:[#allocation11_spill] sm:$0xff] }
 0x454   :  { %3014 = vmatprep.mubr.msk.f32.mxu1 %vm563_vm2, %v2489_v36 }
 0x457   :  { %3015 = vmatmul.mubr.msk.f32.gmra.mrb[22].mxu1 %vm563_vm2, %v2490_v49 }
 0x458   :  { %3017 = vmatprep.mubr.msk.f32.mxu1 %vm563_vm2, %v2491_v43 }
 0x45b   :  { %3018 = vmatmul.mubr.msk.f32.gmra.mrb[24].mxu1 %vm563_vm2, %v2492_v17 }
 0x45c   :  { %3020 = vmatprep.mubr.msk.f32.mxu1 %vm563_vm2, %v2493_v4 }
 0x45f   :  { %3021 = vmatmul.mubr.msk.f32.gmra.mrb[26].mxu1 %vm563_vm2, %v2494_v60 }
 0x460   :  { %3023 = vmatprep.mubr.msk.f32.mxu1 %vm563_vm2, %v2495_v47 }
 0x463   :  { %3024 = vmatmul.mubr.msk.f32.gmra.mrb[28].mxu1 %vm563_vm2, %v2496_v59 }
 0x464   :  { %3026 = vmatprep.mubr.msk.f32.mxu1 %vm563_vm2, %v2497_v37 }
 0x467   :  { %3027 = vmatmul.mubr.msk.f32.gmra.mrb[30].mxu1 %vm563_vm2, %v2498_v2 }
 0x51e   :  { %v3007_v9 = vpop.f32.mrb[16].mxu1 }
 0x51f   :  { %v2697_v45 = vadd.f32 %v3007_v9, %v3983_v25  ;;  %v2617_v30 = vpop.f32.mrb[17].mxu1 }
 0x520   :  { %v2696_v57 = vadd.f32 %v2617_v30, %v3980_v21 }
 0x521   :  { %v2720_v14 = vadd.f32 %v2832_v0, %v2697_v45 }
 0x522   :  { %v2719_v58 = vadd.f32 %v2832_v0, %v2696_v57  ;;  %v3010_v13 = vpop.f32.mrb[18].mxu1 }
 0x523   :  { %2736 = vst.msk [vmem:[%s4876_s22 + $0x8] sm:$0xff] %vm320_vm0, %v2720_v14  ;;  %v2699_v16 = vadd.f32 %v3010_v13, %v3999_v10  ;;  %v2627_v24 = vpop.f32.mrb[19].mxu1 }
 0x524   :  { %2735 = vst.msk [vmem:[%s4876_s22] sm:$0xff] %vm320_vm0, %v2719_v58  ;;  %v2698_v25 = vadd.f32 %v2627_v24, %v3996_v51 }
 0x525   :  { %v2722_v7 = vadd.f32 %v2832_v0, %v2699_v16 }
 0x526   :  { %v2721_v21 = vadd.f32 %v2832_v0, %v2698_v25  ;;  %v3013_v38 = vpop.f32.mrb[20].mxu1 }
 0x527   :  { %2738 = vst.msk [vmem:[%s4876_s22 + $0x18] sm:$0xff] %vm320_vm0, %v2722_v7  ;;  %v2701_v22 = vadd.f32 %v3013_v38, %v4015_v35  ;;  %v2637_v46 = vpop.f32.mrb[21].mxu1 }
 0x528   :  { %2737 = vst.msk [vmem:[%s4876_s22 + $0x10] sm:$0xff] %vm320_vm0, %v2721_v21  ;;  %v2700_v10 = vadd.f32 %v2637_v46, %v4012_v56 }
 0x529   :  { %v2724_v34 = vadd.f32 %v2832_v0, %v2701_v22 }
 0x52a   :  { %v2723_v51 = vadd.f32 %v2832_v0, %v2700_v10  ;;  %v3016_v50 = vpop.f32.mrb[22].mxu1 }
 0x52b   :  { %2740 = vst.msk [vmem:[%s4876_s22 + $0x28] sm:$0xff] %vm320_vm0, %v2724_v34  ;;  %v2703_v26 = vadd.f32 %v3016_v50, %v4031_v8  ;;  %v2647_v23 = vpop.f32.mrb[23].mxu1  ;;  %v4947_v8 = vld [vmem:[#allocation5_spill] sm:$0xff] }
 0x52c   :  { %2739 = vst.msk [vmem:[%s4876_s22 + $0x20] sm:$0xff] %vm320_vm0, %v2723_v51  ;;  %v2702_v35 = vadd.f32 %v2647_v23, %v4028_v63 }
 0x52d   :  { %v2726_v31 = vadd.f32 %v2832_v0, %v2703_v26 }
 0x52e   :  { %v2725_v56 = vadd.f32 %v2832_v0, %v2702_v35  ;;  %v3019_v55 = vpop.f32.mrb[24].mxu1 }
 0x52f   :  { %2742 = vst.msk [vmem:[%s4876_s22 + $0x38] sm:$0xff] %vm320_vm0, %v2726_v31  ;;  %v2705_v19 = vadd.f32 %v3019_v55, %v4946_v18  ;;  %v2657_v54 = vpop.f32.mrb[25].mxu1 }
 0x530   :  { %2741 = vst.msk [vmem:[%s4876_s22 + $0x30] sm:$0xff] %vm320_vm0, %v2725_v56  ;;  %v2704_v44 = vadd.f32 %v2657_v54, %v4947_v8 }
 0x531   :  { %v2728_v53 = vadd.f32 %v2832_v0, %v2705_v19 }
 0x532   :  { %v2727_v63 = vadd.f32 %v2832_v0, %v2704_v44  ;;  %v3022_v28 = vpop.f32.mrb[26].mxu1 }
 0x533   :  { %2744 = vst.msk [vmem:[%s4876_s22 + $0x48] sm:$0xff] %vm320_vm0, %v2728_v53  ;;  %v2707_v41 = vadd.f32 %v3022_v28, %v4948_v1  ;;  %v2667_v62 = vpop.f32.mrb[27].mxu1 }
 0x534   :  { %2743 = vst.msk [vmem:[%s4876_s22 + $0x40] sm:$0xff] %vm320_vm0, %v2727_v63  ;;  %v2706_v52 = vadd.f32 %v2667_v62, %v4949_v33 }
 0x535   :  { %v2730_v29 = vadd.f32 %v2832_v0, %v2707_v41 }
 0x536   :  { %v2729_v27 = vadd.f32 %v2832_v0, %v2706_v52  ;;  %v3025_v32 = vpop.f32.mrb[28].mxu1 }
 0x537   :  { %2746 = vst.msk [vmem:[%s4876_s22 + $0x58] sm:$0xff] %vm320_vm0, %v2730_v29  ;;  %v2709_v15 = vadd.f32 %v3025_v32, %v4950_v39  ;;  %v2677_v12 = vpop.f32.mrb[29].mxu1 }
 0x538   :  { %2745 = vst.msk [vmem:[%s4876_s22 + $0x50] sm:$0xff] %vm320_vm0, %v2729_v27  ;;  %v2708_v6 = vadd.f32 %v2677_v12, %v4951_v20 }
 0x539   :  { %v2732_v5 = vadd.f32 %v2832_v0, %v2709_v15 }
 0x53a   :  { %v2731_v40 = vadd.f32 %v2832_v0, %v2708_v6  ;;  %v3028_v48 = vpop.f32.mrb[30].mxu1 }
 0x53b   :  { %2748 = vst.msk [vmem:[%s4876_s22 + $0x68] sm:$0xff] %vm320_vm0, %v2732_v5  ;;  %v2711_v3 = vadd.f32 %v3028_v48, %v4952_v61  ;;  %v2687_v42 = vpop.f32.mrb[31].mxu1 }
 0x53c   :  { %2747 = vst.msk [vmem:[%s4876_s22 + $0x60] sm:$0xff] %vm320_vm0, %v2731_v40  ;;  %v2710_v36 = vadd.f32 %v2687_v42, %v4953_v11 }
 0x53d   :  { %v2734_v49 = vadd.f32 %v2832_v0, %v2711_v3 }
 0x53e   :  { %v2733_v43 = vadd.f32 %v2832_v0, %v2710_v36 }
 0x53f   :  { %2750 = vst.msk [vmem:[%s4876_s22 + $0x78] sm:$0xff] %vm320_vm0, %v2734_v49 }
 0x540   :  { %2749 = vst.msk [vmem:[%s4876_s22 + $0x70] sm:$0xff] %vm320_vm0, %v2733_v43 }
 0x541   :  { %2755 = vsyncpa [#allocation3], 1 }

</bundles_post_ra>
